<compile_context>
chip_gen: v6e
topology: v6e:2x2x1
jax: 0.10.0
libtpu: 0.0.40
codegen_flags: <defaults>
</compile_context>

<pallas_src>
import jax
import jax.numpy as jnp
from jax import lax
from jax.experimental import pallas as pl
from jax.experimental.pallas import tpu as pltpu


_VMEM = pl.BlockSpec(memory_space=pltpu.MemorySpace.VMEM)


def _vmem_limit(nbytes):
    """Explicit scoped-VMEM budget: actual bytes x4 margin, clamped to [4 MiB, 32 MiB]."""
    return int(min(max(4 * int(nbytes), 4 << 20), 32 << 20))


def _pick_row_tile(n):
    """Largest row tile (multiple of 8) that divides n; fall back to the full extent."""
    for t in (512, 256, 128, 64, 32, 16, 8):
        if n % t == 0:
            return t
    return n


# ----------------------------------------------------------------------------
# Pallas kernels
# ----------------------------------------------------------------------------
def _matmul_bias_kernel(x_ref, w_ref, b_ref, o_ref):
    """o = x @ w + b for one row tile."""
    o_ref[...] = (
        jnp.dot(x_ref[...], w_ref[...], preferred_element_type=jnp.float32) + b_ref[...]
    ).astype(o_ref.dtype)


def _dual_matmul_bias_kernel(a_ref, b_ref, wa_ref, wb_ref, bias_ref, o_ref):
    """o = a @ wa + b @ wb + bias (Linear over [h_fwd | h_bwd] without a concat)."""
    o_ref[...] = (
        jnp.dot(a_ref[...], wa_ref[...], preferred_element_type=jnp.float32)
        + jnp.dot(b_ref[...], wb_ref[...], preferred_element_type=jnp.float32)
        + bias_ref[...]
    ).astype(o_ref.dtype)


def _bilstm_kernel(gx_ref, w_hh_ref, out_f_ref, out_b_ref, h_ref, c_ref):
    """Fused forward+backward LSTM recurrence.

    gx_ref   : (T, B, 8H)  precomputed input gates (x @ W_ih + b_ih + b_hh), per-gate
                           interleaved columns: [i_f i_b | f_f f_b | g_f g_b | o_f o_b]
    w_hh_ref : (2H, 8H)    block-diagonal recurrent weights (rows 0:H fwd, H:2H bwd)
    out_f_ref: (T, B, H)   forward hidden states, time order
    out_b_ref: (T, B, H)   backward hidden states, time order
    h_ref,c_ref: (B, 2H)   VMEM scratch: [h_f | h_b], [c_f | c_b]
    Gate order follows PyTorch: i, f, g, o.
    """
    T, B, _ = gx_ref.shape
    H = out_f_ref.shape[2]
    H2 = 2 * H

    h_ref[...] = jnp.zeros_like(h_ref)
    c_ref[...] = jnp.zeros_like(c_ref)

    # Hoisted (loop-invariant) column mask: True on forward-direction gate columns.
    col = lax.broadcasted_iota(jnp.int32, (B, 4 * H2), 1)
    fwd_mask = (col % H2) < H

    def step(t, carry):
        r = T - 1 - t
        # fwd gates from time t, bwd gates from time T-1-t (pure VPU select, no copies).
        gates_x = jnp.where(fwd_mask, gx_ref[t], gx_ref[r])                   # (B, 8H)
        gates = gates_x + jnp.dot(h_ref[...], w_hh_ref[...],
                                  preferred_element_type=jnp.float32)         # (B, 8H)
        i = jax.nn.sigmoid(gates[:, 0 * H2:1 * H2])
        f = jax.nn.sigmoid(gates[:, 1 * H2:2 * H2])
        g = jnp.tanh(gates[:, 2 * H2:3 * H2])
        o = jax.nn.sigmoid(gates[:, 3 * H2:4 * H2])
        c_new = f * c_ref[...] + i * g                                        # (B, 2H)
        h_new = o * jnp.tanh(c_new)
        c_ref[...] = c_new
        h_ref[...] = h_new
        out_f_ref[t] = h_new[:, :H]
        out_b_ref[r] = h_new[:, H:]
        return carry

    if T <= 32:
        # Short fixed sequence: fully unroll so the scheduler sees across time steps.
        for t in range(T):
            step(t, 0)
    else:
        lax.fori_loop(0, T, step, 0, unroll=2)


# ----------------------------------------------------------------------------
# pallas_call wrappers
# ----------------------------------------------------------------------------
def _run_linear(x2d, w, b):
    """(N, C) @ (C, O) + b, row-tiled & pipelined over N."""
    N, C = x2d.shape
    O = w.shape[1]
    tn = _pick_row_tile(N)
    nbytes = 2 * tn * C * 4 + C * O * 4 + O * 4 + 2 * tn * O * 4
    return pl.pallas_call(
        _matmul_bias_kernel,
        out_shape=jax.ShapeDtypeStruct((N, O), jnp.float32),
        grid=(N // tn,),
        in_specs=[pl.BlockSpec((tn, C), lambda i: (i, 0)),
                  pl.BlockSpec((C, O), lambda i: (0, 0)),
                  pl.BlockSpec((1, O), lambda i: (0, 0))],
        out_specs=pl.BlockSpec((tn, O), lambda i: (i, 0)),
        compiler_params=pltpu.CompilerParams(
            dimension_semantics=("parallel",),
            vmem_limit_bytes=_vmem_limit(nbytes)),
    )(x2d, w, b)


def _run_dual_linear(hf, hb, wf, wb, bias):
    """hf @ wf + hb @ wb + bias, row-tiled; consumes fwd/bwd halves without a concat."""
    N, H = hf.shape
    O = wf.shape[1]
    tn = _pick_row_tile(N)
    nbytes = 4 * tn * H * 4 + 2 * H * O * 4 + O * 4 + 2 * tn * O * 4
    return pl.pallas_call(
        _dual_matmul_bias_kernel,
        out_shape=jax.ShapeDtypeStruct((N, O), jnp.float32),
        grid=(N // tn,),
        in_specs=[pl.BlockSpec((tn, H), lambda i: (i, 0)),
                  pl.BlockSpec((tn, H), lambda i: (i, 0)),
                  pl.BlockSpec((H, O), lambda i: (0, 0)),
                  pl.BlockSpec((H, O), lambda i: (0, 0)),
                  pl.BlockSpec((1, O), lambda i: (0, 0))],
        out_specs=pl.BlockSpec((tn, O), lambda i: (i, 0)),
        compiler_params=pltpu.CompilerParams(
            dimension_semantics=("parallel",),
            vmem_limit_bytes=_vmem_limit(nbytes)),
    )(hf, hb, wf, wb, bias)


def _run_bilstm(gx, w_hh_bd):
    """gx: (T, B, 8H), w_hh_bd: (2H, 8H) -> (out_fwd, out_bwd), each (T, B, H)."""
    T, B, _ = gx.shape
    H = w_hh_bd.shape[0] // 2
    nbytes = gx.size * 4 + w_hh_bd.size * 4 + 2 * T * B * H * 4 + 2 * B * 2 * H * 4
    # TODO(synk): for production OCR shapes (large T*B) tile the batch / keep gx in HBM
    # (memory_space=pl.ANY + emit_pipeline time chunks) so residency fits v7x's 64 MiB VMEM.
    return pl.pallas_call(
        _bilstm_kernel,
        out_shape=(jax.ShapeDtypeStruct((T, B, H), jnp.float32),
                   jax.ShapeDtypeStruct((T, B, H), jnp.float32)),
        in_specs=[_VMEM, _VMEM],
        out_specs=(_VMEM, _VMEM),
        scratch_shapes=[pltpu.VMEM((B, 2 * H), jnp.float32),
                        pltpu.VMEM((B, 2 * H), jnp.float32)],
        compiler_params=pltpu.CompilerParams(vmem_limit_bytes=_vmem_limit(nbytes)),
    )(gx, w_hh_bd)


# ----------------------------------------------------------------------------
# Module forward (time-major across the whole cascade)
# ----------------------------------------------------------------------------
def bidirectional_lstm_layer(x_tm, p):
    """One BidirectionalLSTM(with_linear=True) block.  x_tm: (T, B, C) -> (T, B, out)."""
    T, B, C = x_tm.shape
    H = p["w_lin_f"].shape[0]
    G = p["w_ih_comb"].shape[1]          # 8H

    # 1) Input projection for all time steps and both directions: one big matmul.
    gx = _run_linear(x_tm.reshape(T * B, C), p["w_ih_comb"], p["b_comb"])
    gx = gx.reshape(T, B, G)

    # 2) Fused fwd+bwd recurrence (single Pallas kernel, one MXU push per step).
    h_f, h_b = _run_bilstm(gx, p["w_hh_bd"])             # each (T, B, H)

    # 3) Output Linear over [h_f | h_b] without materializing the concat.
    out = _run_dual_linear(h_f.reshape(T * B, H), h_b.reshape(T * B, H),
                           p["w_lin_f"], p["w_lin_b"], p["b_lin"])
    return out.reshape(T, B, -1)


def encoder_with_cascade_rnn(x_btc, layer_params):
    """EncoderWithCascadeRNN.forward (with_linear=True).  x_btc: (B, T, C)."""
    x_tm = jnp.transpose(x_btc, (1, 0, 2))      # time-major once for the whole cascade
    for p in layer_params:
        x_tm = bidirectional_lstm_layer(x_tm, p)
    return jnp.transpose(x_tm, (1, 0, 2))


# ----------------------------------------------------------------------------
# Parameter initialization (torch nn.LSTM / nn.Linear layout) + fused repack
# ----------------------------------------------------------------------------
def _interleave_gates(a, b, H):
    """Interleave two (..., 4H) gate blocks per gate -> (..., 8H):
    columns [i_a i_b | f_a f_b | g_a g_b | o_a o_b]."""
    lead = a.shape[:-1]
    a4 = a.reshape(*lead, 4, H)
    b4 = b.reshape(*lead, 4, H)
    return jnp.stack([a4, b4], axis=-2).reshape(*lead, 8 * H)


def _init_layer_params(key, input_size, hidden_size, output_size):
    H = hidden_size
    scale = 1.0 / jnp.sqrt(jnp.float32(H))
    keys = jax.random.split(key, 10)

    def u(k, shape, s=scale):
        return jax.random.uniform(k, shape, jnp.float32, -s, s)

    # torch layout: weight_ih (4H, in), weight_hh (4H, H); gate order i, f, g, o.
    w_ih_f = u(keys[0], (4 * H, input_size)).T            # (C, 4H)
    w_hh_f = u(keys[1], (4 * H, H)).T                     # (H, 4H)
    b_f = (u(keys[2], (4 * H,)) + u(keys[3], (4 * H,)))[None, :]
    w_ih_b = u(keys[4], (4 * H, input_size)).T
    w_hh_b = u(keys[5], (4 * H, H)).T
    b_b = (u(keys[6], (4 * H,)) + u(keys[7], (4 * H,)))[None, :]

    lin_scale = 1.0 / jnp.sqrt(jnp.float32(2 * H))
    w_lin = u(keys[8], (output_size, 2 * H), lin_scale).T  # (2H, O)
    b_lin = u(keys[9], (1, output_size), lin_scale)

    raw = dict(w_ih_f=w_ih_f, w_hh_f=w_hh_f, b_f=b_f,
               w_ih_b=w_ih_b, w_hh_b=w_hh_b, b_b=b_b,
               w_lin=w_lin, b_lin=b_lin)

    zeros4 = jnp.zeros((H, 4 * H), jnp.float32)
    fused = dict(
        w_ih_comb=_interleave_gates(w_ih_f, w_ih_b, H),            # (C, 8H)
        b_comb=_interleave_gates(b_f, b_b, H),                     # (1, 8H)
        w_hh_bd=jnp.concatenate(                                   # (2H, 8H) block-diagonal
            [_interleave_gates(w_hh_f, zeros4, H),
             _interleave_gates(zeros4, w_hh_b, H)], axis=0),
        w_lin_f=w_lin[:H],                                         # (H, O)
        w_lin_b=w_lin[H:],                                         # (H, O)
        b_lin=b_lin,                                               # (1, O)
    )
    return fused, raw


def init_encoder_params(key, in_channels, hidden_size, out_channels):
    fused_layers, raw_layers = [], []
    for i in range(len(out_channels)):
        key, sub = jax.random.split(key)
        in_size = in_channels if i == 0 else out_channels[i - 1]
        fused, raw = _init_layer_params(sub, in_size, hidden_size, out_channels[i])
        fused_layers.append(fused)
        raw_layers.append(raw)
    return fused_layers, raw_layers


# ----------------------------------------------------------------------------
# Pure-JAX reference (matches PyTorch bidirectional LSTM + Linear semantics)
# ----------------------------------------------------------------------------
def _reference_lstm_dir(x_tm, w_ih, w_hh, b):
    T, B, _ = x_tm.shape
    H = w_hh.shape[0]
    hi = lax.Precision.HIGHEST

    def step(carry, x_t):
        h, c = carry
        gates = jnp.dot(x_t, w_ih, precision=hi) + jnp.dot(h, w_hh, precision=hi) + b
        i = jax.nn.sigmoid(gates[:, 0 * H:1 * H])
        f = jax.nn.sigmoid(gates[:, 1 * H:2 * H])
        g = jnp.tanh(gates[:, 2 * H:3 * H])
        o = jax.nn.sigmoid(gates[:, 3 * H:4 * H])
        c = f * c + i * g
        h = o * jnp.tanh(c)
        return (h, c), h

    init = (jnp.zeros((B, H), jnp.float32), jnp.zeros((B, H), jnp.float32))
    _, hs = lax.scan(step, init, x_tm)
    return hs


def encoder_reference(x_btc, raw_layers):
    x = jnp.transpose(x_btc, (1, 0, 2))
    hi = lax.Precision.HIGHEST
    for p in raw_layers:
        fwd = _reference_lstm_dir(x, p["w_ih_f"], p["w_hh_f"], p["b_f"])
        bwd = jnp.flip(_reference_lstm_dir(jnp.flip(x, 0),
                                           p["w_ih_b"], p["w_hh_b"], p["b_b"]), 0)
        h = jnp.concatenate([fwd, bwd], axis=-1)
        x = jnp.dot(h, p["w_lin"], precision=hi) + p["b_lin"]
    return jnp.transpose(x, (1, 0, 2))


# ----------------------------------------------------------------------------
if __name__ == "__main__":
    B, T = 2, 8
    in_channels = 16
    hidden_size = 32
    out_channels = [32, 48]          # num_layers = 2; with_linear=True (needed for cascade)

    key = jax.random.PRNGKey(0)
    key_x, key_p = jax.random.split(key)

    x = jax.random.normal(key_x, (B, T, in_channels), jnp.float32)
    fused_params, raw_params = init_encoder_params(
        key_p, in_channels, hidden_size, out_channels)

    run = jax.jit(encoder_with_cascade_rnn)
    out = jax.block_until_ready(run(x, fused_params))

    assert out.shape == (B, T, out_channels[-1]), out.shape
    assert bool(jnp.all(jnp.isfinite(out)))

    ref = jax.block_until_ready(encoder_reference(x, raw_params))
    err = float(jnp.max(jnp.abs(out - ref)))
    assert err < 2e-3, f"max abs error vs reference: {err}"

    print("KERNEL_OK")
</pallas_src>

<mosaic_0001>
module attributes {stable_mosaic.version = 11 : i64} {
  func.func @_matmul_bias_kernel(%arg0: i32, %arg1: memref<16x16xf32, #tpu.memory_space<vmem>>, %arg2: memref<16x256xf32, #tpu.memory_space<vmem>>, %arg3: memref<1x256xf32, #tpu.memory_space<vmem>>, %arg4: memref<16x256xf32, #tpu.memory_space<vmem>>) attributes {dimension_semantics = [#tpu.dimension_semantics<parallel>], iteration_bounds = array<i64: 1>, scalar_prefetch = 0 : i64, scratch_operands = 0 : i64, tpu.core_type = #tpu.core_type<tc>, window_params = [{transform_indices = @transform_0, window_bounds = array<i64: 16, 16>}, {pipeline_mode = #tpu.pipeline_mode<synchronous>, transform_indices = @transform_1, window_bounds = array<i64: 16, 256>}, {pipeline_mode = #tpu.pipeline_mode<synchronous>, transform_indices = @transform_2, window_bounds = array<i64: 1, 256>}, {transform_indices = @transform_3, window_bounds = array<i64: 16, 256>}]} {
    %c0 = arith.constant 0 : index
    %c0_0 = arith.constant 0 : index
    %0 = vector.load %arg1[%c0, %c0_0] : memref<16x16xf32, #tpu.memory_space<vmem>>, vector<16x16xf32>
    %c0_1 = arith.constant 0 : index
    %c0_2 = arith.constant 0 : index
    %1 = vector.load %arg2[%c0_1, %c0_2] : memref<16x256xf32, #tpu.memory_space<vmem>>, vector<16x256xf32>
    %cst = arith.constant dense<0.000000e+00> : vector<16x256xf32>
    %2 = tpu.matmul %0, %1, %cst {dimension_numbers = #tpu.dot_dimension_numbers<[1], [0], [0], [1], [0, 0, 1, 1], [], []>} : vector<16x16xf32>, vector<16x256xf32>, vector<16x256xf32> -> vector<16x256xf32>
    %c0_3 = arith.constant 0 : index
    %c0_4 = arith.constant 0 : index
    %3 = vector.load %arg3[%c0_3, %c0_4] : memref<1x256xf32, #tpu.memory_space<vmem>>, vector<1x256xf32>
    %4 = vector.broadcast %3 : vector<1x256xf32> to vector<16x256xf32>
    %5 = arith.addf %2, %4 : vector<16x256xf32>
    %c0_5 = arith.constant 0 : index
    %c0_6 = arith.constant 0 : index
    %6 = vector.load %arg4[%c0_5, %c0_6] : memref<16x256xf32, #tpu.memory_space<vmem>>, vector<16x256xf32>
    tpu.vector_store %arg4[%c0_5, %c0_6], %5 {strides = array<i32>} : memref<16x256xf32, #tpu.memory_space<vmem>>, vector<16x256xf32>,
    return
  }
  func.func @transform_0(%arg0: i32) -> (i32, i32) {
    %c0_i32 = arith.constant 0 : i32
    %c0_i32_0 = arith.constant 0 : i32
    return %arg0, %c0_i32 : i32, i32
  }
  func.func @transform_1(%arg0: i32) -> (i32, i32) {
    %c0_i32 = arith.constant 0 : i32
    %c0_i32_0 = arith.constant 0 : i32
    %c0_i32_1 = arith.constant 0 : i32
    return %c0_i32, %c0_i32_0 : i32, i32
  }
  func.func @transform_2(%arg0: i32) -> (i32, i32) {
    %c0_i32 = arith.constant 0 : i32
    %c0_i32_0 = arith.constant 0 : i32
    %c0_i32_1 = arith.constant 0 : i32
    return %c0_i32, %c0_i32_0 : i32, i32
  }
  func.func @transform_3(%arg0: i32) -> (i32, i32) {
    %c0_i32 = arith.constant 0 : i32
    %c0_i32_0 = arith.constant 0 : i32
    return %arg0, %c0_i32 : i32, i32
  }
}

module attributes {stable_mosaic.version = 11 : i64} {
  func.func @_bilstm_kernel(%arg0: memref<8x2x256xf32, #tpu.memory_space<vmem>>, %arg1: memref<64x256xf32, #tpu.memory_space<vmem>>, %arg2: memref<8x2x32xf32, #tpu.memory_space<vmem>>, %arg3: memref<8x2x32xf32, #tpu.memory_space<vmem>>, %arg4: memref<2x64xf32, #tpu.memory_space<vmem>>, %arg5: memref<2x64xf32, #tpu.memory_space<vmem>>) attributes {dimension_semantics = [], scalar_prefetch = 0 : i64, scratch_operands = 2 : i64, tpu.core_type = #tpu.core_type<tc>} {
    %cst = arith.constant 0.000000e+00 : f32
    %0 = vector.broadcast %cst : f32 to vector<2x64xf32>
    %c0 = arith.constant 0 : index
    %c0_0 = arith.constant 0 : index
    %1 = vector.load %arg4[%c0, %c0_0] : memref<2x64xf32, #tpu.memory_space<vmem>>, vector<2x64xf32>
    tpu.vector_store %arg4[%c0, %c0_0], %0 {strides = array<i32>} : memref<2x64xf32, #tpu.memory_space<vmem>>, vector<2x64xf32>,
    %cst_1 = arith.constant 0.000000e+00 : f32
    %2 = vector.broadcast %cst_1 : f32 to vector<2x64xf32>
    %c0_2 = arith.constant 0 : index
    %c0_3 = arith.constant 0 : index
    %3 = vector.load %arg5[%c0_2, %c0_3] : memref<2x64xf32, #tpu.memory_space<vmem>>, vector<2x64xf32>
    tpu.vector_store %arg5[%c0_2, %c0_3], %2 {strides = array<i32>} : memref<2x64xf32, #tpu.memory_space<vmem>>, vector<2x64xf32>,
    %4 = tpu.iota {dimensions = array<i32: 1>} : vector<2x256xi32>
    %c64_i32 = arith.constant 64 : i32
    %c0_i32 = arith.constant 0 : i32
    %5 = arith.cmpi eq, %c64_i32, %c0_i32 : i32
    %c1_i32 = arith.constant 1 : i32
    %6 = arith.select %5, %c1_i32, %c64_i32 : i32
    %7 = vector.broadcast %6 : i32 to vector<2x256xi32>
    %8 = arith.remsi %4, %7 : vector<2x256xi32>
    %c0_i32_4 = arith.constant 0 : i32
    %9 = vector.broadcast %c0_i32_4 : i32 to vector<2x256xi32>
    %10 = arith.cmpi ne, %8, %9 : vector<2x256xi32>
    %c0_i32_5 = arith.constant 0 : i32
    %11 = vector.broadcast %c0_i32_5 : i32 to vector<2x256xi32>
    %12 = arith.cmpi slt, %8, %11 : vector<2x256xi32>
    %c0_i32_6 = arith.constant 0 : i32
    %13 = arith.cmpi slt, %6, %c0_i32_6 : i32
    %14 = vector.broadcast %13 : i1 to vector<2x256xi1>
    %15 = vector.broadcast %14 : vector<2x256xi1> to vector<2x256xi1>
    %16 = arith.xori %12, %15 : vector<2x256xi1>
    %17 = arith.andi %16, %10 : vector<2x256xi1>
    %18 = vector.broadcast %6 : i32 to vector<2x256xi32>
    %19 = arith.addi %8, %18 : vector<2x256xi32>
    %20 = arith.select %17, %19, %8 : vector<2x256xi1>, vector<2x256xi32>
    %c32_i32 = arith.constant 32 : i32
    %21 = vector.broadcast %c32_i32 : i32 to vector<2x256xi32>
    %22 = arith.cmpi slt, %20, %21 : vector<2x256xi32>
    %c0_7 = arith.constant 0 : index
    %c0_8 = arith.constant 0 : index
    %c0_9 = arith.constant 0 : index
    %23 = vector.load %arg0[%c0_7, %c0_8, %c0_9] : memref<8x2x256xf32, #tpu.memory_space<vmem>>, vector<1x2x256xf32>
    %24 = vector.shape_cast %23 : vector<1x2x256xf32> to vector<2x256xf32>
    %c7 = arith.constant 7 : index
    %c0_10 = arith.constant 0 : index
    %c0_11 = arith.constant 0 : index
    %25 = vector.load %arg0[%c7, %c0_10, %c0_11] : memref<8x2x256xf32, #tpu.memory_space<vmem>>, vector<1x2x256xf32>
    %26 = vector.shape_cast %25 : vector<1x2x256xf32> to vector<2x256xf32>
    %27 = arith.select %22, %24, %26 : vector<2x256xi1>, vector<2x256xf32>
    %c0_12 = arith.constant 0 : index
    %c0_13 = arith.constant 0 : index
    %28 = vector.load %arg4[%c0_12, %c0_13] : memref<2x64xf32, #tpu.memory_space<vmem>>, vector<2x64xf32>
    %c0_14 = arith.constant 0 : index
    %c0_15 = arith.constant 0 : index
    %29 = vector.load %arg1[%c0_14, %c0_15] : memref<64x256xf32, #tpu.memory_space<vmem>>, vector<64x256xf32>
    %cst_16 = arith.constant dense<0.000000e+00> : vector<2x256xf32>
    %30 = tpu.matmul %28, %29, %cst_16 {dimension_numbers = #tpu.dot_dimension_numbers<[1], [0], [0], [1], [0, 0, 1, 1], [], []>} : vector<2x64xf32>, vector<64x256xf32>, vector<2x256xf32> -> vector<2x256xf32>
    %31 = arith.addf %27, %30 : vector<2x256xf32>
    %32 = vector.extract_strided_slice %31 {offsets = [0, 0], sizes = [2, 64], strides = [1, 1]} : vector<2x256xf32> to vector<2x64xf32>
    %33 = arith.negf %32 : vector<2x64xf32>
    %34 = math.exp %33 : vector<2x64xf32>
    %cst_17 = arith.constant 1.000000e+00 : f32
    %35 = vector.broadcast %cst_17 : f32 to vector<2x64xf32>
    %36 = arith.addf %35, %34 : vector<2x64xf32>
    %37 = arith.divf %35, %36 : vector<2x64xf32>
    %38 = vector.extract_strided_slice %31 {offsets = [0, 64], sizes = [2, 64], strides = [1, 1]} : vector<2x256xf32> to vector<2x64xf32>
    %39 = arith.negf %38 : vector<2x64xf32>
    %40 = math.exp %39 : vector<2x64xf32>
    %cst_18 = arith.constant 1.000000e+00 : f32
    %41 = vector.broadcast %cst_18 : f32 to vector<2x64xf32>
    %42 = arith.addf %41, %40 : vector<2x64xf32>
    %43 = arith.divf %41, %42 : vector<2x64xf32>
    %44 = vector.extract_strided_slice %31 {offsets = [0, 128], sizes = [2, 64], strides = [1, 1]} : vector<2x256xf32> to vector<2x64xf32>
    %45 = math.tanh %44 : vector<2x64xf32>
    %46 = vector.extract_strided_slice %31 {offsets = [0, 192], sizes = [2, 64], strides = [1, 1]} : vector<2x256xf32> to vector<2x64xf32>
    %47 = arith.negf %46 : vector<2x64xf32>
    %48 = math.exp %47 : vector<2x64xf32>
    %cst_19 = arith.constant 1.000000e+00 : f32
    %49 = vector.broadcast %cst_19 : f32 to vector<2x64xf32>
    %50 = arith.addf %49, %48 : vector<2x64xf32>
    %51 = arith.divf %49, %50 : vector<2x64xf32>
    %c0_20 = arith.constant 0 : index
    %c0_21 = arith.constant 0 : index
    %52 = vector.load %arg5[%c0_20, %c0_21] : memref<2x64xf32, #tpu.memory_space<vmem>>, vector<2x64xf32>
    %53 = arith.mulf %43, %52 : vector<2x64xf32>
    %54 = arith.mulf %37, %45 : vector<2x64xf32>
    %55 = arith.addf %53, %54 : vector<2x64xf32>
    %56 = math.tanh %55 : vector<2x64xf32>
    %57 = arith.mulf %51, %56 : vector<2x64xf32>
    %c0_22 = arith.constant 0 : index
    %c0_23 = arith.constant 0 : index
    %58 = vector.load %arg5[%c0_22, %c0_23] : memref<2x64xf32, #tpu.memory_space<vmem>>, vector<2x64xf32>
    tpu.vector_store %arg5[%c0_22, %c0_23], %55 {strides = array<i32>} : memref<2x64xf32, #tpu.memory_space<vmem>>, vector<2x64xf32>,
    %c0_24 = arith.constant 0 : index
    %c0_25 = arith.constant 0 : index
    %59 = vector.load %arg4[%c0_24, %c0_25] : memref<2x64xf32, #tpu.memory_space<vmem>>, vector<2x64xf32>
    tpu.vector_store %arg4[%c0_24, %c0_25], %57 {strides = array<i32>} : memref<2x64xf32, #tpu.memory_space<vmem>>, vector<2x64xf32>,
    %60 = vector.extract_strided_slice %57 {offsets = [0, 0], sizes = [2, 32], strides = [1, 1]} : vector<2x64xf32> to vector<2x32xf32>
    %c0_26 = arith.constant 0 : index
    %c0_27 = arith.constant 0 : index
    %c0_28 = arith.constant 0 : index
    %61 = vector.load %arg2[%c0_26, %c0_27, %c0_28] : memref<8x2x32xf32, #tpu.memory_space<vmem>>, vector<1x2x32xf32>
    %62 = vector.shape_cast %61 : vector<1x2x32xf32> to vector<2x32xf32>
    %63 = vector.shape_cast %60 : vector<2x32xf32> to vector<1x2x32xf32>
    tpu.vector_store %arg2[%c0_26, %c0_27, %c0_28], %63 {strides = array<i32>} : memref<8x2x32xf32, #tpu.memory_space<vmem>>, vector<1x2x32xf32>,
    %64 = vector.extract_strided_slice %57 {offsets = [0, 32], sizes = [2, 32], strides = [1, 1]} : vector<2x64xf32> to vector<2x32xf32>
    %c7_29 = arith.constant 7 : index
    %c0_30 = arith.constant 0 : index
    %c0_31 = arith.constant 0 : index
    %65 = vector.load %arg3[%c7_29, %c0_30, %c0_31] : memref<8x2x32xf32, #tpu.memory_space<vmem>>, vector<1x2x32xf32>
    %66 = vector.shape_cast %65 : vector<1x2x32xf32> to vector<2x32xf32>
    %67 = vector.shape_cast %64 : vector<2x32xf32> to vector<1x2x32xf32>
    tpu.vector_store %arg3[%c7_29, %c0_30, %c0_31], %67 {strides = array<i32>} : memref<8x2x32xf32, #tpu.memory_space<vmem>>, vector<1x2x32xf32>,
    %c1 = arith.constant 1 : index
    %c0_32 = arith.constant 0 : index
    %c0_33 = arith.constant 0 : index
    %68 = vector.load %arg0[%c1, %c0_32, %c0_33] : memref<8x2x256xf32, #tpu.memory_space<vmem>>, vector<1x2x256xf32>
    %69 = vector.shape_cast %68 : vector<1x2x256xf32> to vector<2x256xf32>
    %c6 = arith.constant 6 : index
    %c0_34 = arith.constant 0 : index
    %c0_35 = arith.constant 0 : index
    %70 = vector.load %arg0[%c6, %c0_34, %c0_35] : memref<8x2x256xf32, #tpu.memory_space<vmem>>, vector<1x2x256xf32>
    %71 = vector.shape_cast %70 : vector<1x2x256xf32> to vector<2x256xf32>
    %72 = arith.select %22, %69, %71 : vector<2x256xi1>, vector<2x256xf32>
    %c0_36 = arith.constant 0 : index
    %c0_37 = arith.constant 0 : index
    %73 = vector.load %arg4[%c0_36, %c0_37] : memref<2x64xf32, #tpu.memory_space<vmem>>, vector<2x64xf32>
    %c0_38 = arith.constant 0 : index
    %c0_39 = arith.constant 0 : index
    %74 = vector.load %arg1[%c0_38, %c0_39] : memref<64x256xf32, #tpu.memory_space<vmem>>, vector<64x256xf32>
    %cst_40 = arith.constant dense<0.000000e+00> : vector<2x256xf32>
    %75 = tpu.matmul %73, %74, %cst_40 {dimension_numbers = #tpu.dot_dimension_numbers<[1], [0], [0], [1], [0, 0, 1, 1], [], []>} : vector<2x64xf32>, vector<64x256xf32>, vector<2x256xf32> -> vector<2x256xf32>
    %76 = arith.addf %72, %75 : vector<2x256xf32>
    %77 = vector.extract_strided_slice %76 {offsets = [0, 0], sizes = [2, 64], strides = [1, 1]} : vector<2x256xf32> to vector<2x64xf32>
    %78 = arith.negf %77 : vector<2x64xf32>
    %79 = math.exp %78 : vector<2x64xf32>
    %cst_41 = arith.constant 1.000000e+00 : f32
    %80 = vector.broadcast %cst_41 : f32 to vector<2x64xf32>
    %81 = arith.addf %80, %79 : vector<2x64xf32>
    %82 = arith.divf %80, %81 : vector<2x64xf32>
    %83 = vector.extract_strided_slice %76 {offsets = [0, 64], sizes = [2, 64], strides = [1, 1]} : vector<2x256xf32> to vector<2x64xf32>
    %84 = arith.negf %83 : vector<2x64xf32>
    %85 = math.exp %84 : vector<2x64xf32>
    %cst_42 = arith.constant 1.000000e+00 : f32
    %86 = vector.broadcast %cst_42 : f32 to vector<2x64xf32>
    %87 = arith.addf %86, %85 : vector<2x64xf32>
    %88 = arith.divf %86, %87 : vector<2x64xf32>
    %89 = vector.extract_strided_slice %76 {offsets = [0, 128], sizes = [2, 64], strides = [1, 1]} : vector<2x256xf32> to vector<2x64xf32>
    %90 = math.tanh %89 : vector<2x64xf32>
    %91 = vector.extract_strided_slice %76 {offsets = [0, 192], sizes = [2, 64], strides = [1, 1]} : vector<2x256xf32> to vector<2x64xf32>
    %92 = arith.negf %91 : vector<2x64xf32>
    %93 = math.exp %92 : vector<2x64xf32>
    %cst_43 = arith.constant 1.000000e+00 : f32
    %94 = vector.broadcast %cst_43 : f32 to vector<2x64xf32>
    %95 = arith.addf %94, %93 : vector<2x64xf32>
    %96 = arith.divf %94, %95 : vector<2x64xf32>
    %c0_44 = arith.constant 0 : index
    %c0_45 = arith.constant 0 : index
    %97 = vector.load %arg5[%c0_44, %c0_45] : memref<2x64xf32, #tpu.memory_space<vmem>>, vector<2x64xf32>
    %98 = arith.mulf %88, %97 : vector<2x64xf32>
    %99 = arith.mulf %82, %90 : vector<2x64xf32>
    %100 = arith.addf %98, %99 : vector<2x64xf32>
    %101 = math.tanh %100 : vector<2x64xf32>
    %102 = arith.mulf %96, %101 : vector<2x64xf32>
    %c0_46 = arith.constant 0 : index
    %c0_47 = arith.constant 0 : index
    %103 = vector.load %arg5[%c0_46, %c0_47] : memref<2x64xf32, #tpu.memory_space<vmem>>, vector<2x64xf32>
    tpu.vector_store %arg5[%c0_46, %c0_47], %100 {strides = array<i32>} : memref<2x64xf32, #tpu.memory_space<vmem>>, vector<2x64xf32>,
    %c0_48 = arith.constant 0 : index
    %c0_49 = arith.constant 0 : index
    %104 = vector.load %arg4[%c0_48, %c0_49] : memref<2x64xf32, #tpu.memory_space<vmem>>, vector<2x64xf32>
    tpu.vector_store %arg4[%c0_48, %c0_49], %102 {strides = array<i32>} : memref<2x64xf32, #tpu.memory_space<vmem>>, vector<2x64xf32>,
    %105 = vector.extract_strided_slice %102 {offsets = [0, 0], sizes = [2, 32], strides = [1, 1]} : vector<2x64xf32> to vector<2x32xf32>
    %c1_50 = arith.constant 1 : index
    %c0_51 = arith.constant 0 : index
    %c0_52 = arith.constant 0 : index
    %106 = vector.load %arg2[%c1_50, %c0_51, %c0_52] : memref<8x2x32xf32, #tpu.memory_space<vmem>>, vector<1x2x32xf32>
    %107 = vector.shape_cast %106 : vector<1x2x32xf32> to vector<2x32xf32>
    %108 = vector.shape_cast %105 : vector<2x32xf32> to vector<1x2x32xf32>
    tpu.vector_store %arg2[%c1_50, %c0_51, %c0_52], %108 {strides = array<i32>} : memref<8x2x32xf32, #tpu.memory_space<vmem>>, vector<1x2x32xf32>,
    %109 = vector.extract_strided_slice %102 {offsets = [0, 32], sizes = [2, 32], strides = [1, 1]} : vector<2x64xf32> to vector<2x32xf32>
    %c6_53 = arith.constant 6 : index
    %c0_54 = arith.constant 0 : index
    %c0_55 = arith.constant 0 : index
    %110 = vector.load %arg3[%c6_53, %c0_54, %c0_55] : memref<8x2x32xf32, #tpu.memory_space<vmem>>, vector<1x2x32xf32>
    %111 = vector.shape_cast %110 : vector<1x2x32xf32> to vector<2x32xf32>
    %112 = vector.shape_cast %109 : vector<2x32xf32> to vector<1x2x32xf32>
    tpu.vector_store %arg3[%c6_53, %c0_54, %c0_55], %112 {strides = array<i32>} : memref<8x2x32xf32, #tpu.memory_space<vmem>>, vector<1x2x32xf32>,
    %c2 = arith.constant 2 : index
    %c0_56 = arith.constant 0 : index
    %c0_57 = arith.constant 0 : index
    %113 = vector.load %arg0[%c2, %c0_56, %c0_57] : memref<8x2x256xf32, #tpu.memory_space<vmem>>, vector<1x2x256xf32>
    %114 = vector.shape_cast %113 : vector<1x2x256xf32> to vector<2x256xf32>
    %c5 = arith.constant 5 : index
    %c0_58 = arith.constant 0 : index
    %c0_59 = arith.constant 0 : index
    %115 = vector.load %arg0[%c5, %c0_58, %c0_59] : memref<8x2x256xf32, #tpu.memory_space<vmem>>, vector<1x2x256xf32>
    %116 = vector.shape_cast %115 : vector<1x2x256xf32> to vector<2x256xf32>
    %117 = arith.select %22, %114, %116 : vector<2x256xi1>, vector<2x256xf32>
    %c0_60 = arith.constant 0 : index
    %c0_61 = arith.constant 0 : index
    %118 = vector.load %arg4[%c0_60, %c0_61] : memref<2x64xf32, #tpu.memory_space<vmem>>, vector<2x64xf32>
    %c0_62 = arith.constant 0 : index
    %c0_63 = arith.constant 0 : index
    %119 = vector.load %arg1[%c0_62, %c0_63] : memref<64x256xf32, #tpu.memory_space<vmem>>, vector<64x256xf32>
    %cst_64 = arith.constant dense<0.000000e+00> : vector<2x256xf32>
    %120 = tpu.matmul %118, %119, %cst_64 {dimension_numbers = #tpu.dot_dimension_numbers<[1], [0], [0], [1], [0, 0, 1, 1], [], []>} : vector<2x64xf32>, vector<64x256xf32>, vector<2x256xf32> -> vector<2x256xf32>
    %121 = arith.addf %117, %120 : vector<2x256xf32>
    %122 = vector.extract_strided_slice %121 {offsets = [0, 0], sizes = [2, 64], strides = [1, 1]} : vector<2x256xf32> to vector<2x64xf32>
    %123 = arith.negf %122 : vector<2x64xf32>
    %124 = math.exp %123 : vector<2x64xf32>
    %cst_65 = arith.constant 1.000000e+00 : f32
    %125 = vector.broadcast %cst_65 : f32 to vector<2x64xf32>
    %126 = arith.addf %125, %124 : vector<2x64xf32>
    %127 = arith.divf %125, %126 : vector<2x64xf32>
    %128 = vector.extract_strided_slice %121 {offsets = [0, 64], sizes = [2, 64], strides = [1, 1]} : vector<2x256xf32> to vector<2x64xf32>
    %129 = arith.negf %128 : vector<2x64xf32>
    %130 = math.exp %129 : vector<2x64xf32>
    %cst_66 = arith.constant 1.000000e+00 : f32
    %131 = vector.broadcast %cst_66 : f32 to vector<2x64xf32>
    %132 = arith.addf %131, %130 : vector<2x64xf32>
    %133 = arith.divf %131, %132 : vector<2x64xf32>
    %134 = vector.extract_strided_slice %121 {offsets = [0, 128], sizes = [2, 64], strides = [1, 1]} : vector<2x256xf32> to vector<2x64xf32>
    %135 = math.tanh %134 : vector<2x64xf32>
    %136 = vector.extract_strided_slice %121 {offsets = [0, 192], sizes = [2, 64], strides = [1, 1]} : vector<2x256xf32> to vector<2x64xf32>
    %137 = arith.negf %136 : vector<2x64xf32>
    %138 = math.exp %137 : vector<2x64xf32>
    %cst_67 = arith.constant 1.000000e+00 : f32
    %139 = vector.broadcast %cst_67 : f32 to vector<2x64xf32>
    %140 = arith.addf %139, %138 : vector<2x64xf32>
    %141 = arith.divf %139, %140 : vector<2x64xf32>
    %c0_68 = arith.constant 0 : index
    %c0_69 = arith.constant 0 : index
    %142 = vector.load %arg5[%c0_68, %c0_69] : memref<2x64xf32, #tpu.memory_space<vmem>>, vector<2x64xf32>
    %143 = arith.mulf %133, %142 : vector<2x64xf32>
    %144 = arith.mulf %127, %135 : vector<2x64xf32>
    %145 = arith.addf %143, %144 : vector<2x64xf32>
    %146 = math.tanh %145 : vector<2x64xf32>
    %147 = arith.mulf %141, %146 : vector<2x64xf32>
    %c0_70 = arith.constant 0 : index
    %c0_71 = arith.constant 0 : index
    %148 = vector.load %arg5[%c0_70, %c0_71] : memref<2x64xf32, #tpu.memory_space<vmem>>, vector<2x64xf32>
    tpu.vector_store %arg5[%c0_70, %c0_71], %145 {strides = array<i32>} : memref<2x64xf32, #tpu.memory_space<vmem>>, vector<2x64xf32>,
    %c0_72 = arith.constant 0 : index
    %c0_73 = arith.constant 0 : index
    %149 = vector.load %arg4[%c0_72, %c0_73] : memref<2x64xf32, #tpu.memory_space<vmem>>, vector<2x64xf32>
    tpu.vector_store %arg4[%c0_72, %c0_73], %147 {strides = array<i32>} : memref<2x64xf32, #tpu.memory_space<vmem>>, vector<2x64xf32>,
    %150 = vector.extract_strided_slice %147 {offsets = [0, 0], sizes = [2, 32], strides = [1, 1]} : vector<2x64xf32> to vector<2x32xf32>
    %c2_74 = arith.constant 2 : index
    %c0_75 = arith.constant 0 : index
    %c0_76 = arith.constant 0 : index
    %151 = vector.load %arg2[%c2_74, %c0_75, %c0_76] : memref<8x2x32xf32, #tpu.memory_space<vmem>>, vector<1x2x32xf32>
    %152 = vector.shape_cast %151 : vector<1x2x32xf32> to vector<2x32xf32>
    %153 = vector.shape_cast %150 : vector<2x32xf32> to vector<1x2x32xf32>
    tpu.vector_store %arg2[%c2_74, %c0_75, %c0_76], %153 {strides = array<i32>} : memref<8x2x32xf32, #tpu.memory_space<vmem>>, vector<1x2x32xf32>,
    %154 = vector.extract_strided_slice %147 {offsets = [0, 32], sizes = [2, 32], strides = [1, 1]} : vector<2x64xf32> to vector<2x32xf32>
    %c5_77 = arith.constant 5 : index
    %c0_78 = arith.constant 0 : index
    %c0_79 = arith.constant 0 : index
    %155 = vector.load %arg3[%c5_77, %c0_78, %c0_79] : memref<8x2x32xf32, #tpu.memory_space<vmem>>, vector<1x2x32xf32>
    %156 = vector.shape_cast %155 : vector<1x2x32xf32> to vector<2x32xf32>
    %157 = vector.shape_cast %154 : vector<2x32xf32> to vector<1x2x32xf32>
    tpu.vector_store %arg3[%c5_77, %c0_78, %c0_79], %157 {strides = array<i32>} : memref<8x2x32xf32, #tpu.memory_space<vmem>>, vector<1x2x32xf32>,
    %c3 = arith.constant 3 : index
    %c0_80 = arith.constant 0 : index
    %c0_81 = arith.constant 0 : index
    %158 = vector.load %arg0[%c3, %c0_80, %c0_81] : memref<8x2x256xf32, #tpu.memory_space<vmem>>, vector<1x2x256xf32>
    %159 = vector.shape_cast %158 : vector<1x2x256xf32> to vector<2x256xf32>
    %c4 = arith.constant 4 : index
    %c0_82 = arith.constant 0 : index
    %c0_83 = arith.constant 0 : index
    %160 = vector.load %arg0[%c4, %c0_82, %c0_83] : memref<8x2x256xf32, #tpu.memory_space<vmem>>, vector<1x2x256xf32>
    %161 = vector.shape_cast %160 : vector<1x2x256xf32> to vector<2x256xf32>
    %162 = arith.select %22, %159, %161 : vector<2x256xi1>, vector<2x256xf32>
    %c0_84 = arith.constant 0 : index
    %c0_85 = arith.constant 0 : index
    %163 = vector.load %arg4[%c0_84, %c0_85] : memref<2x64xf32, #tpu.memory_space<vmem>>, vector<2x64xf32>
    %c0_86 = arith.constant 0 : index
    %c0_87 = arith.constant 0 : index
    %164 = vector.load %arg1[%c0_86, %c0_87] : memref<64x256xf32, #tpu.memory_space<vmem>>, vector<64x256xf32>
    %cst_88 = arith.constant dense<0.000000e+00> : vector<2x256xf32>
    %165 = tpu.matmul %163, %164, %cst_88 {dimension_numbers = #tpu.dot_dimension_numbers<[1], [0], [0], [1], [0, 0, 1, 1], [], []>} : vector<2x64xf32>, vector<64x256xf32>, vector<2x256xf32> -> vector<2x256xf32>
    %166 = arith.addf %162, %165 : vector<2x256xf32>
    %167 = vector.extract_strided_slice %166 {offsets = [0, 0], sizes = [2, 64], strides = [1, 1]} : vector<2x256xf32> to vector<2x64xf32>
    %168 = arith.negf %167 : vector<2x64xf32>
    %169 = math.exp %168 : vector<2x64xf32>
    %cst_89 = arith.constant 1.000000e+00 : f32
    %170 = vector.broadcast %cst_89 : f32 to vector<2x64xf32>
    %171 = arith.addf %170, %169 : vector<2x64xf32>
    %172 = arith.divf %170, %171 : vector<2x64xf32>
    %173 = vector.extract_strided_slice %166 {offsets = [0, 64], sizes = [2, 64], strides = [1, 1]} : vector<2x256xf32> to vector<2x64xf32>
    %174 = arith.negf %173 : vector<2x64xf32>
    %175 = math.exp %174 : vector<2x64xf32>
    %cst_90 = arith.constant 1.000000e+00 : f32
    %176 = vector.broadcast %cst_90 : f32 to vector<2x64xf32>
    %177 = arith.addf %176, %175 : vector<2x64xf32>
    %178 = arith.divf %176, %177 : vector<2x64xf32>
    %179 = vector.extract_strided_slice %166 {offsets = [0, 128], sizes = [2, 64], strides = [1, 1]} : vector<2x256xf32> to vector<2x64xf32>
    %180 = math.tanh %179 : vector<2x64xf32>
    %181 = vector.extract_strided_slice %166 {offsets = [0, 192], sizes = [2, 64], strides = [1, 1]} : vector<2x256xf32> to vector<2x64xf32>
    %182 = arith.negf %181 : vector<2x64xf32>
    %183 = math.exp %182 : vector<2x64xf32>
    %cst_91 = arith.constant 1.000000e+00 : f32
    %184 = vector.broadcast %cst_91 : f32 to vector<2x64xf32>
    %185 = arith.addf %184, %183 : vector<2x64xf32>
    %186 = arith.divf %184, %185 : vector<2x64xf32>
    %c0_92 = arith.constant 0 : index
    %c0_93 = arith.constant 0 : index
    %187 = vector.load %arg5[%c0_92, %c0_93] : memref<2x64xf32, #tpu.memory_space<vmem>>, vector<2x64xf32>
    %188 = arith.mulf %178, %187 : vector<2x64xf32>
    %189 = arith.mulf %172, %180 : vector<2x64xf32>
    %190 = arith.addf %188, %189 : vector<2x64xf32>
    %191 = math.tanh %190 : vector<2x64xf32>
    %192 = arith.mulf %186, %191 : vector<2x64xf32>
    %c0_94 = arith.constant 0 : index
    %c0_95 = arith.constant 0 : index
    %193 = vector.load %arg5[%c0_94, %c0_95] : memref<2x64xf32, #tpu.memory_space<vmem>>, vector<2x64xf32>
    tpu.vector_store %arg5[%c0_94, %c0_95], %190 {strides = array<i32>} : memref<2x64xf32, #tpu.memory_space<vmem>>, vector<2x64xf32>,
    %c0_96 = arith.constant 0 : index
    %c0_97 = arith.constant 0 : index
    %194 = vector.load %arg4[%c0_96, %c0_97] : memref<2x64xf32, #tpu.memory_space<vmem>>, vector<2x64xf32>
    tpu.vector_store %arg4[%c0_96, %c0_97], %192 {strides = array<i32>} : memref<2x64xf32, #tpu.memory_space<vmem>>, vector<2x64xf32>,
    %195 = vector.extract_strided_slice %192 {offsets = [0, 0], sizes = [2, 32], strides = [1, 1]} : vector<2x64xf32> to vector<2x32xf32>
    %c3_98 = arith.constant 3 : index
    %c0_99 = arith.constant 0 : index
    %c0_100 = arith.constant 0 : index
    %196 = vector.load %arg2[%c3_98, %c0_99, %c0_100] : memref<8x2x32xf32, #tpu.memory_space<vmem>>, vector<1x2x32xf32>
    %197 = vector.shape_cast %196 : vector<1x2x32xf32> to vector<2x32xf32>
    %198 = vector.shape_cast %195 : vector<2x32xf32> to vector<1x2x32xf32>
    tpu.vector_store %arg2[%c3_98, %c0_99, %c0_100], %198 {strides = array<i32>} : memref<8x2x32xf32, #tpu.memory_space<vmem>>, vector<1x2x32xf32>,
    %199 = vector.extract_strided_slice %192 {offsets = [0, 32], sizes = [2, 32], strides = [1, 1]} : vector<2x64xf32> to vector<2x32xf32>
    %c4_101 = arith.constant 4 : index
    %c0_102 = arith.constant 0 : index
    %c0_103 = arith.constant 0 : index
    %200 = vector.load %arg3[%c4_101, %c0_102, %c0_103] : memref<8x2x32xf32, #tpu.memory_space<vmem>>, vector<1x2x32xf32>
    %201 = vector.shape_cast %200 : vector<1x2x32xf32> to vector<2x32xf32>
    %202 = vector.shape_cast %199 : vector<2x32xf32> to vector<1x2x32xf32>
    tpu.vector_store %arg3[%c4_101, %c0_102, %c0_103], %202 {strides = array<i32>} : memref<8x2x32xf32, #tpu.memory_space<vmem>>, vector<1x2x32xf32>,
    %c4_104 = arith.constant 4 : index
    %c0_105 = arith.constant 0 : index
    %c0_106 = arith.constant 0 : index
    %203 = vector.load %arg0[%c4_104, %c0_105, %c0_106] : memref<8x2x256xf32, #tpu.memory_space<vmem>>, vector<1x2x256xf32>
    %204 = vector.shape_cast %203 : vector<1x2x256xf32> to vector<2x256xf32>
    %c3_107 = arith.constant 3 : index
    %c0_108 = arith.constant 0 : index
    %c0_109 = arith.constant 0 : index
    %205 = vector.load %arg0[%c3_107, %c0_108, %c0_109] : memref<8x2x256xf32, #tpu.memory_space<vmem>>, vector<1x2x256xf32>
    %206 = vector.shape_cast %205 : vector<1x2x256xf32> to vector<2x256xf32>
    %207 = arith.select %22, %204, %206 : vector<2x256xi1>, vector<2x256xf32>
    %c0_110 = arith.constant 0 : index
    %c0_111 = arith.constant 0 : index
    %208 = vector.load %arg4[%c0_110, %c0_111] : memref<2x64xf32, #tpu.memory_space<vmem>>, vector<2x64xf32>
    %c0_112 = arith.constant 0 : index
    %c0_113 = arith.constant 0 : index
    %209 = vector.load %arg1[%c0_112, %c0_113] : memref<64x256xf32, #tpu.memory_space<vmem>>, vector<64x256xf32>
    %cst_114 = arith.constant dense<0.000000e+00> : vector<2x256xf32>
    %210 = tpu.matmul %208, %209, %cst_114 {dimension_numbers = #tpu.dot_dimension_numbers<[1], [0], [0], [1], [0, 0, 1, 1], [], []>} : vector<2x64xf32>, vector<64x256xf32>, vector<2x256xf32> -> vector<2x256xf32>
    %211 = arith.addf %207, %210 : vector<2x256xf32>
    %212 = vector.extract_strided_slice %211 {offsets = [0, 0], sizes = [2, 64], strides = [1, 1]} : vector<2x256xf32> to vector<2x64xf32>
    %213 = arith.negf %212 : vector<2x64xf32>
    %214 = math.exp %213 : vector<2x64xf32>
    %cst_115 = arith.constant 1.000000e+00 : f32
    %215 = vector.broadcast %cst_115 : f32 to vector<2x64xf32>
    %216 = arith.addf %215, %214 : vector<2x64xf32>
    %217 = arith.divf %215, %216 : vector<2x64xf32>
    %218 = vector.extract_strided_slice %211 {offsets = [0, 64], sizes = [2, 64], strides = [1, 1]} : vector<2x256xf32> to vector<2x64xf32>
    %219 = arith.negf %218 : vector<2x64xf32>
    %220 = math.exp %219 : vector<2x64xf32>
    %cst_116 = arith.constant 1.000000e+00 : f32
    %221 = vector.broadcast %cst_116 : f32 to vector<2x64xf32>
    %222 = arith.addf %221, %220 : vector<2x64xf32>
    %223 = arith.divf %221, %222 : vector<2x64xf32>
    %224 = vector.extract_strided_slice %211 {offsets = [0, 128], sizes = [2, 64], strides = [1, 1]} : vector<2x256xf32> to vector<2x64xf32>
    %225 = math.tanh %224 : vector<2x64xf32>
    %226 = vector.extract_strided_slice %211 {offsets = [0, 192], sizes = [2, 64], strides = [1, 1]} : vector<2x256xf32> to vector<2x64xf32>
    %227 = arith.negf %226 : vector<2x64xf32>
    %228 = math.exp %227 : vector<2x64xf32>
    %cst_117 = arith.constant 1.000000e+00 : f32
    %229 = vector.broadcast %cst_117 : f32 to vector<2x64xf32>
    %230 = arith.addf %229, %228 : vector<2x64xf32>
    %231 = arith.divf %229, %230 : vector<2x64xf32>
    %c0_118 = arith.constant 0 : index
    %c0_119 = arith.constant 0 : index
    %232 = vector.load %arg5[%c0_118, %c0_119] : memref<2x64xf32, #tpu.memory_space<vmem>>, vector<2x64xf32>
    %233 = arith.mulf %223, %232 : vector<2x64xf32>
    %234 = arith.mulf %217, %225 : vector<2x64xf32>
    %235 = arith.addf %233, %234 : vector<2x64xf32>
    %236 = math.tanh %235 : vector<2x64xf32>
    %237 = arith.mulf %231, %236 : vector<2x64xf32>
    %c0_120 = arith.constant 0 : index
    %c0_121 = arith.constant 0 : index
    %238 = vector.load %arg5[%c0_120, %c0_121] : memref<2x64xf32, #tpu.memory_space<vmem>>, vector<2x64xf32>
    tpu.vector_store %arg5[%c0_120, %c0_121], %235 {strides = array<i32>} : memref<2x64xf32, #tpu.memory_space<vmem>>, vector<2x64xf32>,
    %c0_122 = arith.constant 0 : index
    %c0_123 = arith.constant 0 : index
    %239 = vector.load %arg4[%c0_122, %c0_123] : memref<2x64xf32, #tpu.memory_space<vmem>>, vector<2x64xf32>
    tpu.vector_store %arg4[%c0_122, %c0_123], %237 {strides = array<i32>} : memref<2x64xf32, #tpu.memory_space<vmem>>, vector<2x64xf32>,
    %240 = vector.extract_strided_slice %237 {offsets = [0, 0], sizes = [2, 32], strides = [1, 1]} : vector<2x64xf32> to vector<2x32xf32>
    %c4_124 = arith.constant 4 : index
    %c0_125 = arith.constant 0 : index
    %c0_126 = arith.constant 0 : index
    %241 = vector.load %arg2[%c4_124, %c0_125, %c0_126] : memref<8x2x32xf32, #tpu.memory_space<vmem>>, vector<1x2x32xf32>
    %242 = vector.shape_cast %241 : vector<1x2x32xf32> to vector<2x32xf32>
    %243 = vector.shape_cast %240 : vector<2x32xf32> to vector<1x2x32xf32>
    tpu.vector_store %arg2[%c4_124, %c0_125, %c0_126], %243 {strides = array<i32>} : memref<8x2x32xf32, #tpu.memory_space<vmem>>, vector<1x2x32xf32>,
    %244 = vector.extract_strided_slice %237 {offsets = [0, 32], sizes = [2, 32], strides = [1, 1]} : vector<2x64xf32> to vector<2x32xf32>
    %c3_127 = arith.constant 3 : index
    %c0_128 = arith.constant 0 : index
    %c0_129 = arith.constant 0 : index
    %245 = vector.load %arg3[%c3_127, %c0_128, %c0_129] : memref<8x2x32xf32, #tpu.memory_space<vmem>>, vector<1x2x32xf32>
    %246 = vector.shape_cast %245 : vector<1x2x32xf32> to vector<2x32xf32>
    %247 = vector.shape_cast %244 : vector<2x32xf32> to vector<1x2x32xf32>
    tpu.vector_store %arg3[%c3_127, %c0_128, %c0_129], %247 {strides = array<i32>} : memref<8x2x32xf32, #tpu.memory_space<vmem>>, vector<1x2x32xf32>,
    %c5_130 = arith.constant 5 : index
    %c0_131 = arith.constant 0 : index
    %c0_132 = arith.constant 0 : index
    %248 = vector.load %arg0[%c5_130, %c0_131, %c0_132] : memref<8x2x256xf32, #tpu.memory_space<vmem>>, vector<1x2x256xf32>
    %249 = vector.shape_cast %248 : vector<1x2x256xf32> to vector<2x256xf32>
    %c2_133 = arith.constant 2 : index
    %c0_134 = arith.constant 0 : index
    %c0_135 = arith.constant 0 : index
    %250 = vector.load %arg0[%c2_133, %c0_134, %c0_135] : memref<8x2x256xf32, #tpu.memory_space<vmem>>, vector<1x2x256xf32>
    %251 = vector.shape_cast %250 : vector<1x2x256xf32> to vector<2x256xf32>
    %252 = arith.select %22, %249, %251 : vector<2x256xi1>, vector<2x256xf32>
    %c0_136 = arith.constant 0 : index
    %c0_137 = arith.constant 0 : index
    %253 = vector.load %arg4[%c0_136, %c0_137] : memref<2x64xf32, #tpu.memory_space<vmem>>, vector<2x64xf32>
    %c0_138 = arith.constant 0 : index
    %c0_139 = arith.constant 0 : index
    %254 = vector.load %arg1[%c0_138, %c0_139] : memref<64x256xf32, #tpu.memory_space<vmem>>, vector<64x256xf32>
    %cst_140 = arith.constant dense<0.000000e+00> : vector<2x256xf32>
    %255 = tpu.matmul %253, %254, %cst_140 {dimension_numbers = #tpu.dot_dimension_numbers<[1], [0], [0], [1], [0, 0, 1, 1], [], []>} : vector<2x64xf32>, vector<64x256xf32>, vector<2x256xf32> -> vector<2x256xf32>
    %256 = arith.addf %252, %255 : vector<2x256xf32>
    %257 = vector.extract_strided_slice %256 {offsets = [0, 0], sizes = [2, 64], strides = [1, 1]} : vector<2x256xf32> to vector<2x64xf32>
    %258 = arith.negf %257 : vector<2x64xf32>
    %259 = math.exp %258 : vector<2x64xf32>
    %cst_141 = arith.constant 1.000000e+00 : f32
    %260 = vector.broadcast %cst_141 : f32 to vector<2x64xf32>
    %261 = arith.addf %260, %259 : vector<2x64xf32>
    %262 = arith.divf %260, %261 : vector<2x64xf32>
    %263 = vector.extract_strided_slice %256 {offsets = [0, 64], sizes = [2, 64], strides = [1, 1]} : vector<2x256xf32> to vector<2x64xf32>
    %264 = arith.negf %263 : vector<2x64xf32>
    %265 = math.exp %264 : vector<2x64xf32>
    %cst_142 = arith.constant 1.000000e+00 : f32
    %266 = vector.broadcast %cst_142 : f32 to vector<2x64xf32>
    %267 = arith.addf %266, %265 : vector<2x64xf32>
    %268 = arith.divf %266, %267 : vector<2x64xf32>
    %269 = vector.extract_strided_slice %256 {offsets = [0, 128], sizes = [2, 64], strides = [1, 1]} : vector<2x256xf32> to vector<2x64xf32>
    %270 = math.tanh %269 : vector<2x64xf32>
    %271 = vector.extract_strided_slice %256 {offsets = [0, 192], sizes = [2, 64], strides = [1, 1]} : vector<2x256xf32> to vector<2x64xf32>
    %272 = arith.negf %271 : vector<2x64xf32>
    %273 = math.exp %272 : vector<2x64xf32>
    %cst_143 = arith.constant 1.000000e+00 : f32
    %274 = vector.broadcast %cst_143 : f32 to vector<2x64xf32>
    %275 = arith.addf %274, %273 : vector<2x64xf32>
    %276 = arith.divf %274, %275 : vector<2x64xf32>
    %c0_144 = arith.constant 0 : index
    %c0_145 = arith.constant 0 : index
    %277 = vector.load %arg5[%c0_144, %c0_145] : memref<2x64xf32, #tpu.memory_space<vmem>>, vector<2x64xf32>
    %278 = arith.mulf %268, %277 : vector<2x64xf32>
    %279 = arith.mulf %262, %270 : vector<2x64xf32>
    %280 = arith.addf %278, %279 : vector<2x64xf32>
    %281 = math.tanh %280 : vector<2x64xf32>
    %282 = arith.mulf %276, %281 : vector<2x64xf32>
    %c0_146 = arith.constant 0 : index
    %c0_147 = arith.constant 0 : index
    %283 = vector.load %arg5[%c0_146, %c0_147] : memref<2x64xf32, #tpu.memory_space<vmem>>, vector<2x64xf32>
    tpu.vector_store %arg5[%c0_146, %c0_147], %280 {strides = array<i32>} : memref<2x64xf32, #tpu.memory_space<vmem>>, vector<2x64xf32>,
    %c0_148 = arith.constant 0 : index
    %c0_149 = arith.constant 0 : index
    %284 = vector.load %arg4[%c0_148, %c0_149] : memref<2x64xf32, #tpu.memory_space<vmem>>, vector<2x64xf32>
    tpu.vector_store %arg4[%c0_148, %c0_149], %282 {strides = array<i32>} : memref<2x64xf32, #tpu.memory_space<vmem>>, vector<2x64xf32>,
    %285 = vector.extract_strided_slice %282 {offsets = [0, 0], sizes = [2, 32], strides = [1, 1]} : vector<2x64xf32> to vector<2x32xf32>
    %c5_150 = arith.constant 5 : index
    %c0_151 = arith.constant 0 : index
    %c0_152 = arith.constant 0 : index
    %286 = vector.load %arg2[%c5_150, %c0_151, %c0_152] : memref<8x2x32xf32, #tpu.memory_space<vmem>>, vector<1x2x32xf32>
    %287 = vector.shape_cast %286 : vector<1x2x32xf32> to vector<2x32xf32>
    %288 = vector.shape_cast %285 : vector<2x32xf32> to vector<1x2x32xf32>
    tpu.vector_store %arg2[%c5_150, %c0_151, %c0_152], %288 {strides = array<i32>} : memref<8x2x32xf32, #tpu.memory_space<vmem>>, vector<1x2x32xf32>,
    %289 = vector.extract_strided_slice %282 {offsets = [0, 32], sizes = [2, 32], strides = [1, 1]} : vector<2x64xf32> to vector<2x32xf32>
    %c2_153 = arith.constant 2 : index
    %c0_154 = arith.constant 0 : index
    %c0_155 = arith.constant 0 : index
    %290 = vector.load %arg3[%c2_153, %c0_154, %c0_155] : memref<8x2x32xf32, #tpu.memory_space<vmem>>, vector<1x2x32xf32>
    %291 = vector.shape_cast %290 : vector<1x2x32xf32> to vector<2x32xf32>
    %292 = vector.shape_cast %289 : vector<2x32xf32> to vector<1x2x32xf32>
    tpu.vector_store %arg3[%c2_153, %c0_154, %c0_155], %292 {strides = array<i32>} : memref<8x2x32xf32, #tpu.memory_space<vmem>>, vector<1x2x32xf32>,
    %c6_156 = arith.constant 6 : index
    %c0_157 = arith.constant 0 : index
    %c0_158 = arith.constant 0 : index
    %293 = vector.load %arg0[%c6_156, %c0_157, %c0_158] : memref<8x2x256xf32, #tpu.memory_space<vmem>>, vector<1x2x256xf32>
    %294 = vector.shape_cast %293 : vector<1x2x256xf32> to vector<2x256xf32>
    %c1_159 = arith.constant 1 : index
    %c0_160 = arith.constant 0 : index
    %c0_161 = arith.constant 0 : index
    %295 = vector.load %arg0[%c1_159, %c0_160, %c0_161] : memref<8x2x256xf32, #tpu.memory_space<vmem>>, vector<1x2x256xf32>
    %296 = vector.shape_cast %295 : vector<1x2x256xf32> to vector<2x256xf32>
    %297 = arith.select %22, %294, %296 : vector<2x256xi1>, vector<2x256xf32>
    %c0_162 = arith.constant 0 : index
    %c0_163 = arith.constant 0 : index
    %298 = vector.load %arg4[%c0_162, %c0_163] : memref<2x64xf32, #tpu.memory_space<vmem>>, vector<2x64xf32>
    %c0_164 = arith.constant 0 : index
    %c0_165 = arith.constant 0 : index
    %299 = vector.load %arg1[%c0_164, %c0_165] : memref<64x256xf32, #tpu.memory_space<vmem>>, vector<64x256xf32>
    %cst_166 = arith.constant dense<0.000000e+00> : vector<2x256xf32>
    %300 = tpu.matmul %298, %299, %cst_166 {dimension_numbers = #tpu.dot_dimension_numbers<[1], [0], [0], [1], [0, 0, 1, 1], [], []>} : vector<2x64xf32>, vector<64x256xf32>, vector<2x256xf32> -> vector<2x256xf32>
    %301 = arith.addf %297, %300 : vector<2x256xf32>
    %302 = vector.extract_strided_slice %301 {offsets = [0, 0], sizes = [2, 64], strides = [1, 1]} : vector<2x256xf32> to vector<2x64xf32>
    %303 = arith.negf %302 : vector<2x64xf32>
    %304 = math.exp %303 : vector<2x64xf32>
    %cst_167 = arith.constant 1.000000e+00 : f32
    %305 = vector.broadcast %cst_167 : f32 to vector<2x64xf32>
    %306 = arith.addf %305, %304 : vector<2x64xf32>
    %307 = arith.divf %305, %306 : vector<2x64xf32>
    %308 = vector.extract_strided_slice %301 {offsets = [0, 64], sizes = [2, 64], strides = [1, 1]} : vector<2x256xf32> to vector<2x64xf32>
    %309 = arith.negf %308 : vector<2x64xf32>
    %310 = math.exp %309 : vector<2x64xf32>
    %cst_168 = arith.constant 1.000000e+00 : f32
    %311 = vector.broadcast %cst_168 : f32 to vector<2x64xf32>
    %312 = arith.addf %311, %310 : vector<2x64xf32>
    %313 = arith.divf %311, %312 : vector<2x64xf32>
    %314 = vector.extract_strided_slice %301 {offsets = [0, 128], sizes = [2, 64], strides = [1, 1]} : vector<2x256xf32> to vector<2x64xf32>
    %315 = math.tanh %314 : vector<2x64xf32>
    %316 = vector.extract_strided_slice %301 {offsets = [0, 192], sizes = [2, 64], strides = [1, 1]} : vector<2x256xf32> to vector<2x64xf32>
    %317 = arith.negf %316 : vector<2x64xf32>
    %318 = math.exp %317 : vector<2x64xf32>
    %cst_169 = arith.constant 1.000000e+00 : f32
    %319 = vector.broadcast %cst_169 : f32 to vector<2x64xf32>
    %320 = arith.addf %319, %318 : vector<2x64xf32>
    %321 = arith.divf %319, %320 : vector<2x64xf32>
    %c0_170 = arith.constant 0 : index
    %c0_171 = arith.constant 0 : index
    %322 = vector.load %arg5[%c0_170, %c0_171] : memref<2x64xf32, #tpu.memory_space<vmem>>, vector<2x64xf32>
    %323 = arith.mulf %313, %322 : vector<2x64xf32>
    %324 = arith.mulf %307, %315 : vector<2x64xf32>
    %325 = arith.addf %323, %324 : vector<2x64xf32>
    %326 = math.tanh %325 : vector<2x64xf32>
    %327 = arith.mulf %321, %326 : vector<2x64xf32>
    %c0_172 = arith.constant 0 : index
    %c0_173 = arith.constant 0 : index
    %328 = vector.load %arg5[%c0_172, %c0_173] : memref<2x64xf32, #tpu.memory_space<vmem>>, vector<2x64xf32>
    tpu.vector_store %arg5[%c0_172, %c0_173], %325 {strides = array<i32>} : memref<2x64xf32, #tpu.memory_space<vmem>>, vector<2x64xf32>,
    %c0_174 = arith.constant 0 : index
    %c0_175 = arith.constant 0 : index
    %329 = vector.load %arg4[%c0_174, %c0_175] : memref<2x64xf32, #tpu.memory_space<vmem>>, vector<2x64xf32>
    tpu.vector_store %arg4[%c0_174, %c0_175], %327 {strides = array<i32>} : memref<2x64xf32, #tpu.memory_space<vmem>>, vector<2x64xf32>,
    %330 = vector.extract_strided_slice %327 {offsets = [0, 0], sizes = [2, 32], strides = [1, 1]} : vector<2x64xf32> to vector<2x32xf32>
    %c6_176 = arith.constant 6 : index
    %c0_177 = arith.constant 0 : index
    %c0_178 = arith.constant 0 : index
    %331 = vector.load %arg2[%c6_176, %c0_177, %c0_178] : memref<8x2x32xf32, #tpu.memory_space<vmem>>, vector<1x2x32xf32>
    %332 = vector.shape_cast %331 : vector<1x2x32xf32> to vector<2x32xf32>
    %333 = vector.shape_cast %330 : vector<2x32xf32> to vector<1x2x32xf32>
    tpu.vector_store %arg2[%c6_176, %c0_177, %c0_178], %333 {strides = array<i32>} : memref<8x2x32xf32, #tpu.memory_space<vmem>>, vector<1x2x32xf32>,
    %334 = vector.extract_strided_slice %327 {offsets = [0, 32], sizes = [2, 32], strides = [1, 1]} : vector<2x64xf32> to vector<2x32xf32>
    %c1_179 = arith.constant 1 : index
    %c0_180 = arith.constant 0 : index
    %c0_181 = arith.constant 0 : index
    %335 = vector.load %arg3[%c1_179, %c0_180, %c0_181] : memref<8x2x32xf32, #tpu.memory_space<vmem>>, vector<1x2x32xf32>
    %336 = vector.shape_cast %335 : vector<1x2x32xf32> to vector<2x32xf32>
    %337 = vector.shape_cast %334 : vector<2x32xf32> to vector<1x2x32xf32>
    tpu.vector_store %arg3[%c1_179, %c0_180, %c0_181], %337 {strides = array<i32>} : memref<8x2x32xf32, #tpu.memory_space<vmem>>, vector<1x2x32xf32>,
    %c7_182 = arith.constant 7 : index
    %c0_183 = arith.constant 0 : index
    %c0_184 = arith.constant 0 : index
    %338 = vector.load %arg0[%c7_182, %c0_183, %c0_184] : memref<8x2x256xf32, #tpu.memory_space<vmem>>, vector<1x2x256xf32>
    %339 = vector.shape_cast %338 : vector<1x2x256xf32> to vector<2x256xf32>
    %c0_185 = arith.constant 0 : index
    %c0_186 = arith.constant 0 : index
    %c0_187 = arith.constant 0 : index
    %340 = vector.load %arg0[%c0_185, %c0_186, %c0_187] : memref<8x2x256xf32, #tpu.memory_space<vmem>>, vector<1x2x256xf32>
    %341 = vector.shape_cast %340 : vector<1x2x256xf32> to vector<2x256xf32>
    %342 = arith.select %22, %339, %341 : vector<2x256xi1>, vector<2x256xf32>
    %c0_188 = arith.constant 0 : index
    %c0_189 = arith.constant 0 : index
    %343 = vector.load %arg4[%c0_188, %c0_189] : memref<2x64xf32, #tpu.memory_space<vmem>>, vector<2x64xf32>
    %c0_190 = arith.constant 0 : index
    %c0_191 = arith.constant 0 : index
    %344 = vector.load %arg1[%c0_190, %c0_191] : memref<64x256xf32, #tpu.memory_space<vmem>>, vector<64x256xf32>
    %cst_192 = arith.constant dense<0.000000e+00> : vector<2x256xf32>
    %345 = tpu.matmul %343, %344, %cst_192 {dimension_numbers = #tpu.dot_dimension_numbers<[1], [0], [0], [1], [0, 0, 1, 1], [], []>} : vector<2x64xf32>, vector<64x256xf32>, vector<2x256xf32> -> vector<2x256xf32>
    %346 = arith.addf %342, %345 : vector<2x256xf32>
    %347 = vector.extract_strided_slice %346 {offsets = [0, 0], sizes = [2, 64], strides = [1, 1]} : vector<2x256xf32> to vector<2x64xf32>
    %348 = arith.negf %347 : vector<2x64xf32>
    %349 = math.exp %348 : vector<2x64xf32>
    %cst_193 = arith.constant 1.000000e+00 : f32
    %350 = vector.broadcast %cst_193 : f32 to vector<2x64xf32>
    %351 = arith.addf %350, %349 : vector<2x64xf32>
    %352 = arith.divf %350, %351 : vector<2x64xf32>
    %353 = vector.extract_strided_slice %346 {offsets = [0, 64], sizes = [2, 64], strides = [1, 1]} : vector<2x256xf32> to vector<2x64xf32>
    %354 = arith.negf %353 : vector<2x64xf32>
    %355 = math.exp %354 : vector<2x64xf32>
    %cst_194 = arith.constant 1.000000e+00 : f32
    %356 = vector.broadcast %cst_194 : f32 to vector<2x64xf32>
    %357 = arith.addf %356, %355 : vector<2x64xf32>
    %358 = arith.divf %356, %357 : vector<2x64xf32>
    %359 = vector.extract_strided_slice %346 {offsets = [0, 128], sizes = [2, 64], strides = [1, 1]} : vector<2x256xf32> to vector<2x64xf32>
    %360 = math.tanh %359 : vector<2x64xf32>
    %361 = vector.extract_strided_slice %346 {offsets = [0, 192], sizes = [2, 64], strides = [1, 1]} : vector<2x256xf32> to vector<2x64xf32>
    %362 = arith.negf %361 : vector<2x64xf32>
    %363 = math.exp %362 : vector<2x64xf32>
    %cst_195 = arith.constant 1.000000e+00 : f32
    %364 = vector.broadcast %cst_195 : f32 to vector<2x64xf32>
    %365 = arith.addf %364, %363 : vector<2x64xf32>
    %366 = arith.divf %364, %365 : vector<2x64xf32>
    %c0_196 = arith.constant 0 : index
    %c0_197 = arith.constant 0 : index
    %367 = vector.load %arg5[%c0_196, %c0_197] : memref<2x64xf32, #tpu.memory_space<vmem>>, vector<2x64xf32>
    %368 = arith.mulf %358, %367 : vector<2x64xf32>
    %369 = arith.mulf %352, %360 : vector<2x64xf32>
    %370 = arith.addf %368, %369 : vector<2x64xf32>
    %371 = math.tanh %370 : vector<2x64xf32>
    %372 = arith.mulf %366, %371 : vector<2x64xf32>
    %c0_198 = arith.constant 0 : index
    %c0_199 = arith.constant 0 : index
    %373 = vector.load %arg5[%c0_198, %c0_199] : memref<2x64xf32, #tpu.memory_space<vmem>>, vector<2x64xf32>
    tpu.vector_store %arg5[%c0_198, %c0_199], %370 {strides = array<i32>} : memref<2x64xf32, #tpu.memory_space<vmem>>, vector<2x64xf32>,
    %c0_200 = arith.constant 0 : index
    %c0_201 = arith.constant 0 : index
    %374 = vector.load %arg4[%c0_200, %c0_201] : memref<2x64xf32, #tpu.memory_space<vmem>>, vector<2x64xf32>
    tpu.vector_store %arg4[%c0_200, %c0_201], %372 {strides = array<i32>} : memref<2x64xf32, #tpu.memory_space<vmem>>, vector<2x64xf32>,
    %375 = vector.extract_strided_slice %372 {offsets = [0, 0], sizes = [2, 32], strides = [1, 1]} : vector<2x64xf32> to vector<2x32xf32>
    %c7_202 = arith.constant 7 : index
    %c0_203 = arith.constant 0 : index
    %c0_204 = arith.constant 0 : index
    %376 = vector.load %arg2[%c7_202, %c0_203, %c0_204] : memref<8x2x32xf32, #tpu.memory_space<vmem>>, vector<1x2x32xf32>
    %377 = vector.shape_cast %376 : vector<1x2x32xf32> to vector<2x32xf32>
    %378 = vector.shape_cast %375 : vector<2x32xf32> to vector<1x2x32xf32>
    tpu.vector_store %arg2[%c7_202, %c0_203, %c0_204], %378 {strides = array<i32>} : memref<8x2x32xf32, #tpu.memory_space<vmem>>, vector<1x2x32xf32>,
    %379 = vector.extract_strided_slice %372 {offsets = [0, 32], sizes = [2, 32], strides = [1, 1]} : vector<2x64xf32> to vector<2x32xf32>
    %c0_205 = arith.constant 0 : index
    %c0_206 = arith.constant 0 : index
    %c0_207 = arith.constant 0 : index
    %380 = vector.load %arg3[%c0_205, %c0_206, %c0_207] : memref<8x2x32xf32, #tpu.memory_space<vmem>>, vector<1x2x32xf32>
    %381 = vector.shape_cast %380 : vector<1x2x32xf32> to vector<2x32xf32>
    %382 = vector.shape_cast %379 : vector<2x32xf32> to vector<1x2x32xf32>
    tpu.vector_store %arg3[%c0_205, %c0_206, %c0_207], %382 {strides = array<i32>} : memref<8x2x32xf32, #tpu.memory_space<vmem>>, vector<1x2x32xf32>,
    return
  }
}

module attributes {stable_mosaic.version = 11 : i64} {
  func.func @_matmul_bias_kernel(%arg0: i32, %arg1: memref<16x32xf32, #tpu.memory_space<vmem>>, %arg2: memref<32x256xf32, #tpu.memory_space<vmem>>, %arg3: memref<1x256xf32, #tpu.memory_space<vmem>>, %arg4: memref<16x256xf32, #tpu.memory_space<vmem>>) attributes {dimension_semantics = [#tpu.dimension_semantics<parallel>], iteration_bounds = array<i64: 1>, scalar_prefetch = 0 : i64, scratch_operands = 0 : i64, tpu.core_type = #tpu.core_type<tc>, window_params = [{transform_indices = @transform_0, window_bounds = array<i64: 16, 32>}, {pipeline_mode = #tpu.pipeline_mode<synchronous>, transform_indices = @transform_1, window_bounds = array<i64: 32, 256>}, {pipeline_mode = #tpu.pipeline_mode<synchronous>, transform_indices = @transform_2, window_bounds = array<i64: 1, 256>}, {transform_indices = @transform_3, window_bounds = array<i64: 16, 256>}]} {
    %c0 = arith.constant 0 : index
    %c0_0 = arith.constant 0 : index
    %0 = vector.load %arg1[%c0, %c0_0] : memref<16x32xf32, #tpu.memory_space<vmem>>, vector<16x32xf32>
    %c0_1 = arith.constant 0 : index
    %c0_2 = arith.constant 0 : index
    %1 = vector.load %arg2[%c0_1, %c0_2] : memref<32x256xf32, #tpu.memory_space<vmem>>, vector<32x256xf32>
    %cst = arith.constant dense<0.000000e+00> : vector<16x256xf32>
    %2 = tpu.matmul %0, %1, %cst {dimension_numbers = #tpu.dot_dimension_numbers<[1], [0], [0], [1], [0, 0, 1, 1], [], []>} : vector<16x32xf32>, vector<32x256xf32>, vector<16x256xf32> -> vector<16x256xf32>
    %c0_3 = arith.constant 0 : index
    %c0_4 = arith.constant 0 : index
    %3 = vector.load %arg3[%c0_3, %c0_4] : memref<1x256xf32, #tpu.memory_space<vmem>>, vector<1x256xf32>
    %4 = vector.broadcast %3 : vector<1x256xf32> to vector<16x256xf32>
    %5 = arith.addf %2, %4 : vector<16x256xf32>
    %c0_5 = arith.constant 0 : index
    %c0_6 = arith.constant 0 : index
    %6 = vector.load %arg4[%c0_5, %c0_6] : memref<16x256xf32, #tpu.memory_space<vmem>>, vector<16x256xf32>
    tpu.vector_store %arg4[%c0_5, %c0_6], %5 {strides = array<i32>} : memref<16x256xf32, #tpu.memory_space<vmem>>, vector<16x256xf32>,
    return
  }
  func.func @transform_0(%arg0: i32) -> (i32, i32) {
    %c0_i32 = arith.constant 0 : i32
    %c0_i32_0 = arith.constant 0 : i32
    return %arg0, %c0_i32 : i32, i32
  }
  func.func @transform_1(%arg0: i32) -> (i32, i32) {
    %c0_i32 = arith.constant 0 : i32
    %c0_i32_0 = arith.constant 0 : i32
    %c0_i32_1 = arith.constant 0 : i32
    return %c0_i32, %c0_i32_0 : i32, i32
  }
  func.func @transform_2(%arg0: i32) -> (i32, i32) {
    %c0_i32 = arith.constant 0 : i32
    %c0_i32_0 = arith.constant 0 : i32
    %c0_i32_1 = arith.constant 0 : i32
    return %c0_i32, %c0_i32_0 : i32, i32
  }
  func.func @transform_3(%arg0: i32) -> (i32, i32) {
    %c0_i32 = arith.constant 0 : i32
    %c0_i32_0 = arith.constant 0 : i32
    return %arg0, %c0_i32 : i32, i32
  }
}

module attributes {stable_mosaic.version = 11 : i64} {
  func.func @_dual_matmul_bias_kernel(%arg0: i32, %arg1: memref<16x32xf32, #tpu.memory_space<vmem>>, %arg2: memref<16x32xf32, #tpu.memory_space<vmem>>, %arg3: memref<32x32xf32, #tpu.memory_space<vmem>>, %arg4: memref<32x32xf32, #tpu.memory_space<vmem>>, %arg5: memref<1x32xf32, #tpu.memory_space<vmem>>, %arg6: memref<16x32xf32, #tpu.memory_space<vmem>>) attributes {dimension_semantics = [#tpu.dimension_semantics<parallel>], iteration_bounds = array<i64: 1>, scalar_prefetch = 0 : i64, scratch_operands = 0 : i64, tpu.core_type = #tpu.core_type<tc>, window_params = [{transform_indices = @transform_0, window_bounds = array<i64: 16, 32>}, {transform_indices = @transform_1, window_bounds = array<i64: 16, 32>}, {pipeline_mode = #tpu.pipeline_mode<synchronous>, transform_indices = @transform_2, window_bounds = array<i64: 32, 32>}, {pipeline_mode = #tpu.pipeline_mode<synchronous>, transform_indices = @transform_3, window_bounds = array<i64: 32, 32>}, {pipeline_mode = #tpu.pipeline_mode<synchronous>, transform_indices = @transform_4, window_bounds = array<i64: 1, 32>}, {transform_indices = @transform_5, window_bounds = array<i64: 16, 32>}]} {
    %c0 = arith.constant 0 : index
    %c0_0 = arith.constant 0 : index
    %0 = vector.load %arg1[%c0, %c0_0] : memref<16x32xf32, #tpu.memory_space<vmem>>, vector<16x32xf32>
    %c0_1 = arith.constant 0 : index
    %c0_2 = arith.constant 0 : index
    %1 = vector.load %arg3[%c0_1, %c0_2] : memref<32x32xf32, #tpu.memory_space<vmem>>, vector<32x32xf32>
    %cst = arith.constant dense<0.000000e+00> : vector<16x32xf32>
    %2 = tpu.matmul %0, %1, %cst {dimension_numbers = #tpu.dot_dimension_numbers<[1], [0], [0], [1], [0, 0, 1, 1], [], []>} : vector<16x32xf32>, vector<32x32xf32>, vector<16x32xf32> -> vector<16x32xf32>
    %c0_3 = arith.constant 0 : index
    %c0_4 = arith.constant 0 : index
    %3 = vector.load %arg2[%c0_3, %c0_4] : memref<16x32xf32, #tpu.memory_space<vmem>>, vector<16x32xf32>
    %c0_5 = arith.constant 0 : index
    %c0_6 = arith.constant 0 : index
    %4 = vector.load %arg4[%c0_5, %c0_6] : memref<32x32xf32, #tpu.memory_space<vmem>>, vector<32x32xf32>
    %cst_7 = arith.constant dense<0.000000e+00> : vector<16x32xf32>
    %5 = tpu.matmul %3, %4, %cst_7 {dimension_numbers = #tpu.dot_dimension_numbers<[1], [0], [0], [1], [0, 0, 1, 1], [], []>} : vector<16x32xf32>, vector<32x32xf32>, vector<16x32xf32> -> vector<16x32xf32>
    %6 = arith.addf %2, %5 : vector<16x32xf32>
    %c0_8 = arith.constant 0 : index
    %c0_9 = arith.constant 0 : index
    %7 = vector.load %arg5[%c0_8, %c0_9] : memref<1x32xf32, #tpu.memory_space<vmem>>, vector<1x32xf32>
    %8 = vector.broadcast %7 : vector<1x32xf32> to vector<16x32xf32>
    %9 = arith.addf %6, %8 : vector<16x32xf32>
    %c0_10 = arith.constant 0 : index
    %c0_11 = arith.constant 0 : index
    %10 = vector.load %arg6[%c0_10, %c0_11] : memref<16x32xf32, #tpu.memory_space<vmem>>, vector<16x32xf32>
    tpu.vector_store %arg6[%c0_10, %c0_11], %9 {strides = array<i32>} : memref<16x32xf32, #tpu.memory_space<vmem>>, vector<16x32xf32>,
    return
  }
  func.func @transform_0(%arg0: i32) -> (i32, i32) {
    %c0_i32 = arith.constant 0 : i32
    %c0_i32_0 = arith.constant 0 : i32
    return %arg0, %c0_i32 : i32, i32
  }
  func.func @transform_1(%arg0: i32) -> (i32, i32) {
    %c0_i32 = arith.constant 0 : i32
    %c0_i32_0 = arith.constant 0 : i32
    return %arg0, %c0_i32 : i32, i32
  }
  func.func @transform_2(%arg0: i32) -> (i32, i32) {
    %c0_i32 = arith.constant 0 : i32
    %c0_i32_0 = arith.constant 0 : i32
    %c0_i32_1 = arith.constant 0 : i32
    return %c0_i32, %c0_i32_0 : i32, i32
  }
  func.func @transform_3(%arg0: i32) -> (i32, i32) {
    %c0_i32 = arith.constant 0 : i32
    %c0_i32_0 = arith.constant 0 : i32
    %c0_i32_1 = arith.constant 0 : i32
    return %c0_i32, %c0_i32_0 : i32, i32
  }
  func.func @transform_4(%arg0: i32) -> (i32, i32) {
    %c0_i32 = arith.constant 0 : i32
    %c0_i32_0 = arith.constant 0 : i32
    %c0_i32_1 = arith.constant 0 : i32
    return %c0_i32, %c0_i32_0 : i32, i32
  }
  func.func @transform_5(%arg0: i32) -> (i32, i32) {
    %c0_i32 = arith.constant 0 : i32
    %c0_i32_0 = arith.constant 0 : i32
    return %arg0, %c0_i32 : i32, i32
  }
}

module attributes {stable_mosaic.version = 11 : i64} {
  func.func @_dual_matmul_bias_kernel(%arg0: i32, %arg1: memref<16x32xf32, #tpu.memory_space<vmem>>, %arg2: memref<16x32xf32, #tpu.memory_space<vmem>>, %arg3: memref<32x48xf32, #tpu.memory_space<vmem>>, %arg4: memref<32x48xf32, #tpu.memory_space<vmem>>, %arg5: memref<1x48xf32, #tpu.memory_space<vmem>>, %arg6: memref<16x48xf32, #tpu.memory_space<vmem>>) attributes {dimension_semantics = [#tpu.dimension_semantics<parallel>], iteration_bounds = array<i64: 1>, scalar_prefetch = 0 : i64, scratch_operands = 0 : i64, tpu.core_type = #tpu.core_type<tc>, window_params = [{transform_indices = @transform_0, window_bounds = array<i64: 16, 32>}, {transform_indices = @transform_1, window_bounds = array<i64: 16, 32>}, {pipeline_mode = #tpu.pipeline_mode<synchronous>, transform_indices = @transform_2, window_bounds = array<i64: 32, 48>}, {pipeline_mode = #tpu.pipeline_mode<synchronous>, transform_indices = @transform_3, window_bounds = array<i64: 32, 48>}, {pipeline_mode = #tpu.pipeline_mode<synchronous>, transform_indices = @transform_4, window_bounds = array<i64: 1, 48>}, {transform_indices = @transform_5, window_bounds = array<i64: 16, 48>}]} {
    %c0 = arith.constant 0 : index
    %c0_0 = arith.constant 0 : index
    %0 = vector.load %arg1[%c0, %c0_0] : memref<16x32xf32, #tpu.memory_space<vmem>>, vector<16x32xf32>
    %c0_1 = arith.constant 0 : index
    %c0_2 = arith.constant 0 : index
    %1 = vector.load %arg3[%c0_1, %c0_2] : memref<32x48xf32, #tpu.memory_space<vmem>>, vector<32x48xf32>
    %cst = arith.constant dense<0.000000e+00> : vector<16x48xf32>
    %2 = tpu.matmul %0, %1, %cst {dimension_numbers = #tpu.dot_dimension_numbers<[1], [0], [0], [1], [0, 0, 1, 1], [], []>} : vector<16x32xf32>, vector<32x48xf32>, vector<16x48xf32> -> vector<16x48xf32>
    %c0_3 = arith.constant 0 : index
    %c0_4 = arith.constant 0 : index
    %3 = vector.load %arg2[%c0_3, %c0_4] : memref<16x32xf32, #tpu.memory_space<vmem>>, vector<16x32xf32>
    %c0_5 = arith.constant 0 : index
    %c0_6 = arith.constant 0 : index
    %4 = vector.load %arg4[%c0_5, %c0_6] : memref<32x48xf32, #tpu.memory_space<vmem>>, vector<32x48xf32>
    %cst_7 = arith.constant dense<0.000000e+00> : vector<16x48xf32>
    %5 = tpu.matmul %3, %4, %cst_7 {dimension_numbers = #tpu.dot_dimension_numbers<[1], [0], [0], [1], [0, 0, 1, 1], [], []>} : vector<16x32xf32>, vector<32x48xf32>, vector<16x48xf32> -> vector<16x48xf32>
    %6 = arith.addf %2, %5 : vector<16x48xf32>
    %c0_8 = arith.constant 0 : index
    %c0_9 = arith.constant 0 : index
    %7 = vector.load %arg5[%c0_8, %c0_9] : memref<1x48xf32, #tpu.memory_space<vmem>>, vector<1x48xf32>
    %8 = vector.broadcast %7 : vector<1x48xf32> to vector<16x48xf32>
    %9 = arith.addf %6, %8 : vector<16x48xf32>
    %c0_10 = arith.constant 0 : index
    %c0_11 = arith.constant 0 : index
    %10 = vector.load %arg6[%c0_10, %c0_11] : memref<16x48xf32, #tpu.memory_space<vmem>>, vector<16x48xf32>
    tpu.vector_store %arg6[%c0_10, %c0_11], %9 {strides = array<i32>} : memref<16x48xf32, #tpu.memory_space<vmem>>, vector<16x48xf32>,
    return
  }
  func.func @transform_0(%arg0: i32) -> (i32, i32) {
    %c0_i32 = arith.constant 0 : i32
    %c0_i32_0 = arith.constant 0 : i32
    return %arg0, %c0_i32 : i32, i32
  }
  func.func @transform_1(%arg0: i32) -> (i32, i32) {
    %c0_i32 = arith.constant 0 : i32
    %c0_i32_0 = arith.constant 0 : i32
    return %arg0, %c0_i32 : i32, i32
  }
  func.func @transform_2(%arg0: i32) -> (i32, i32) {
    %c0_i32 = arith.constant 0 : i32
    %c0_i32_0 = arith.constant 0 : i32
    %c0_i32_1 = arith.constant 0 : i32
    return %c0_i32, %c0_i32_0 : i32, i32
  }
  func.func @transform_3(%arg0: i32) -> (i32, i32) {
    %c0_i32 = arith.constant 0 : i32
    %c0_i32_0 = arith.constant 0 : i32
    %c0_i32_1 = arith.constant 0 : i32
    return %c0_i32, %c0_i32_0 : i32, i32
  }
  func.func @transform_4(%arg0: i32) -> (i32, i32) {
    %c0_i32 = arith.constant 0 : i32
    %c0_i32_0 = arith.constant 0 : i32
    %c0_i32_1 = arith.constant 0 : i32
    return %c0_i32, %c0_i32_0 : i32, i32
  }
  func.func @transform_5(%arg0: i32) -> (i32, i32) {
    %c0_i32 = arith.constant 0 : i32
    %c0_i32_0 = arith.constant 0 : i32
    return %arg0, %c0_i32 : i32, i32
  }
}

</mosaic_0001>

<bundles_post_ra>
// kernel: encoder_with_cascade_rnn.6
= control target key start
LH: loop header
LB: loop body
LE: loop exit
PB: predicated region body
PF: predicated region fallthrough
CT: control target
= control target key end

     0   :  { %8 = vsyncpa [#allocation3], 0  ;;  %s167_s12 = smov [#allocation2]   ;;  %s222_s0 = inlined_call_operand.vmem [shape: f32[16,16], index: 0, kind: input, shape index: {}]   ;;  %s223_s1 = inlined_call_operand.vmem [shape: f32[16,256], index: 1, kind: input, shape index: {}]   ;;  %s224_s2 = inlined_call_operand.hbm [shape: f32[1,256], index: 2, kind: input, shape index: {}]   ;;  %s225_s3 = inlined_call_operand.vmem [shape: f32[16,256], index: 3, kind: output, shape index: {}]  }
   0x1   :  { %s19_s13 = sshll.u32 %s167_s12, 4  ;;  %s20_s13 = int_to_ptr.vmem [resolvable:$true] %s19_s13 }
   0x2   :  { %s153_s14 = scalar_lea.vmem %s20_s13, 32  ;;  %p158_p1 = scmp.lt.s32.totalorder %s20_s13, %s20_s13 }
   0x3   :  { %p154_p0 = scmp.ne.s32.totalorder %s20_s13, %s153_s14  ;;  %p159_p2 = scmp.lt.s32.totalorder %s153_s14, %s153_s14 }
   0x5   :  { %p160_p3 = por %p159_p2, %p158_p1 }
   0x7   :  { %p161_p4 = pnand %p160_p3, %p154_p0 }
   0x9   :  { %164 = shalt.err (!%p161_p4)
}
   0xa   :  { %22 = dma.hbm_to_vmem [thread:$0]  %s224_s2, 32, %s20_s13, [#allocation3]  }
   0xb   :  { %165 = dma.done.wait [#allocation3], 32  }
   0xc   :  { %166 = vsyncadd [#allocation3], 4294967264  ;;  %v168_v0 = vmov 0.0   ;;  %v31_v1 = vld [vmem:[%s223_s1 + $0x18] sm:$0xff]  ;;  %v30_v2 = vld [vmem:[%s223_s1 + $0x10] sm:$0xff]  ;;  %vm44_vm0 = vcmask 130048   ;;  %v34_v7 = vlaneseq }
   0xd   :  { %115 = vmatprep.mubr.f32.mxu0 %v168_v0  ;;  %121 = vmatprep.mubr.f32.mxu1 %v168_v0  ;;  %v29_v3 = vld [vmem:[%s223_s1 + $0x8] sm:$0xff]  ;;  %v28_v4 = vld [vmem:[%s223_s1] sm:$0xff] }
   0xe   :  { %79 = vmatprep.subr.mxu0 %v31_v1  ;;  %139 = vmatprep.subr.mxu1 %v31_v1  ;;  %v26_v5 = vld [vmem:[%s222_s0] sm:$0xff]  ;;  %v27_v6 = vld [vmem:[%s222_s0 + $0x8] sm:$0xff]  ;;  %v35_v8 = vshrl.u32 %v34_v7, 7 }
   0xf   :  { %80 = vmatpush1.msra.mxu0 %v30_v2  ;;  %141 = vmatpush1.msra.mxu1 %v30_v2  ;;  %v32_v10 = vld [vmem:[#allocation2] sm:$0x3] }
  0x10   :  { %81 = vmatprep.subr.mxu0 %v29_v3  ;;  %140 = vmatprep.subr.mxu1 %v29_v3  ;;  %v36_v9 = vsub.s32 0, %v35_v8  ;;  %v40_v11 = vsub.s32 1, %v35_v8 }
  0x11   :  { %82 = vmatpush1.msra.mxu0 %v28_v4  ;;  %142 = vmatpush1.msra.mxu1 %v28_v4 }
  0x12   :  { %137 = vmatmul.mubr.msk.f32.vlgmr.msra.gmra.mxu0 %vm44_vm0, %v26_v5  ;;  %138 = vmatmul.mubr.msk.f32.vlgmr.msra.gmra.mxu1 %vm44_vm0, %v27_v6  ;;  %v37_v12 = vrot.slane %v32_v10, %v36_v9  ;;  %v41_v13 = vrot.slane %v32_v10, %v40_v11 }
  0xd2   :  { %v117_v14 = vpop.f32.mrf.mxu0  ;;  %v123_v15 = vpop.f32.mrf.mxu1 }
  0xd3   :  { %v118_v16 = vadd.f32 %v117_v14, %v37_v12  ;;  %v124_v17 = vadd.f32 %v123_v15, %v37_v12 }
  0xd4   :  { %v119_v18 = vpop.f32.mrf.mxu0  ;;  %v125_v19 = vpop.f32.mrf.mxu1 }
  0xd5   :  { %128 = vst [vmem:[%s225_s3] sm:$0xff] %v118_v16  ;;  %130 = vst [vmem:[%s225_s3 + $0x10] sm:$0xff] %v124_v17  ;;  %v120_v20 = vadd.f32 %v119_v18, %v41_v13  ;;  %v126_v21 = vadd.f32 %v125_v19, %v41_v13 }
  0xd7   :  { %129 = vst [vmem:[%s225_s3 + $0x8] sm:$0xff] %v120_v20  ;;  %131 = vst [vmem:[%s225_s3 + $0x18] sm:$0xff] %v126_v21 }
  0xd8   :  { %136 = vsyncpa [#allocation3], 1 }

// kernel: encoder_with_cascade_rnn.9
= control target key start
LH: loop header
LB: loop body
LE: loop exit
PB: predicated region body
PF: predicated region fallthrough
CT: control target
= control target key end

     0   :  { %v139_v3 = vmov 0.0   ;;  %vm36_vm0 = vcmask 261120   ;;  %v26_v11 = vlaneseq  ;;  %s205_s1 = inlined_call_operand.vmem [shape: f32[32,256], index: 1, kind: input, shape index: {}]   ;;  %s206_s0 = inlined_call_operand.vmem [shape: f32[16,32], index: 0, kind: input, shape index: {}]   ;;  %s207_s2 = inlined_call_operand.vmem [shape: f32[1,256], index: 2, kind: input, shape index: {}]   ;;  %s208_s3 = inlined_call_operand.vmem [shape: f32[16,256], index: 3, kind: output, shape index: {}]  }
   0x1   :  { %v23_v0 = vld [vmem:[%s205_s1 + $0x38] sm:$0xff]  ;;  %v22_v1 = vld [vmem:[%s205_s1 + $0x30] sm:$0xff]  ;;  %v21_v2 = vld [vmem:[%s205_s1 + $0x28] sm:$0xff]  ;;  %107 = vmatprep.mubr.f32.mxu0 %v139_v3  ;;  %113 = vmatprep.mubr.f32.mxu1 %v139_v3 }
   0x2   :  { %67 = vmatprep.subr.mxu0 %v23_v0  ;;  %130 = vmatprep.subr.mxu1 %v23_v0  ;;  %v20_v4 = vld [vmem:[%s205_s1 + $0x20] sm:$0xff]  ;;  %v19_v5 = vld [vmem:[%s205_s1 + $0x18] sm:$0xff]  ;;  %v18_v6 = vld [vmem:[%s205_s1 + $0x10] sm:$0xff]  ;;  %v27_v12 = vshrl.u32 %v26_v11, 7 }
   0x3   :  { %68 = vmatpush1.msra.mxu0 %v22_v1  ;;  %134 = vmatpush1.msra.mxu1 %v22_v1  ;;  %v17_v7 = vld [vmem:[%s205_s1 + $0x8] sm:$0xff]  ;;  %v16_v8 = vld [vmem:[%s205_s1] sm:$0xff] }
   0x4   :  { %69 = vmatprep.subr.mxu0 %v21_v2  ;;  %131 = vmatprep.subr.mxu1 %v21_v2  ;;  %v14_v9 = vld [vmem:[%s206_s0] sm:$0xff]  ;;  %v15_v10 = vld [vmem:[%s206_s0 + $0x8] sm:$0xff]  ;;  %v28_v13 = vsub.s32 0, %v27_v12  ;;  %v32_v15 = vsub.s32 1, %v27_v12 }
   0x5   :  { %70 = vmatpush1.msra.mxu0 %v20_v4  ;;  %135 = vmatpush1.msra.mxu1 %v20_v4  ;;  %v24_v14 = vld [vmem:[%s207_s2] sm:$0x3] }
   0x6   :  { %71 = vmatprep.subr.mxu0 %v19_v5  ;;  %132 = vmatprep.subr.mxu1 %v19_v5  ;;  %v29_v16 = vrot.slane %v24_v14, %v28_v13  ;;  %v33_v17 = vrot.slane %v24_v14, %v32_v15 }
   0x7   :  { %72 = vmatpush1.msra.mxu0 %v18_v6  ;;  %136 = vmatpush1.msra.mxu1 %v18_v6 }
   0x8   :  { %73 = vmatprep.subr.mxu0 %v17_v7  ;;  %133 = vmatprep.subr.mxu1 %v17_v7 }
   0x9   :  { %74 = vmatpush1.msra.mxu0 %v16_v8  ;;  %137 = vmatpush1.msra.mxu1 %v16_v8 }
   0xa   :  { %128 = vmatmul.mubr.msk.f32.vlgmr.msra.gmra.mxu0 %vm36_vm0, %v14_v9  ;;  %129 = vmatmul.mubr.msk.f32.vlgmr.msra.gmra.mxu1 %vm36_vm0, %v15_v10 }
  0xca   :  { %v109_v18 = vpop.f32.mrf.mxu0  ;;  %v115_v19 = vpop.f32.mrf.mxu1 }
  0xcb   :  { %v110_v20 = vadd.f32 %v109_v18, %v29_v16  ;;  %v116_v21 = vadd.f32 %v115_v19, %v29_v16 }
  0xcc   :  { %v111_v22 = vpop.f32.mrf.mxu0  ;;  %v117_v23 = vpop.f32.mrf.mxu1 }
  0xcd   :  { %120 = vst [vmem:[%s208_s3] sm:$0xff] %v110_v20  ;;  %122 = vst [vmem:[%s208_s3 + $0x10] sm:$0xff] %v116_v21  ;;  %v112_v24 = vadd.f32 %v111_v22, %v33_v17  ;;  %v118_v25 = vadd.f32 %v117_v23, %v33_v17 }
  0xcf   :  { %121 = vst [vmem:[%s208_s3 + $0x8] sm:$0xff] %v112_v24  ;;  %123 = vst [vmem:[%s208_s3 + $0x18] sm:$0xff] %v118_v25 }

// kernel: encoder_with_cascade_rnn.8
= control target key start
LH: loop header
LB: loop body
LE: loop exit
PB: predicated region body
PF: predicated region fallthrough
CT: control target
= control target key end

     0   :  { %vm32_vm0 = vcmask 261120   ;;  %s330_s3 = inlined_call_operand.vmem [shape: f32[32,32], index: 3, kind: input, shape index: {}]   ;;  %s331_s2 = inlined_call_operand.vmem [shape: f32[32,32], index: 2, kind: input, shape index: {}]   ;;  %s332_s1 = inlined_call_operand.vmem [shape: f32[16,32], index: 1, kind: input, shape index: {}]   ;;  %s333_s0 = inlined_call_operand.vmem [shape: f32[16,32], index: 0, kind: input, shape index: {}]   ;;  %s334_s4 = inlined_call_operand.vmem [shape: f32[1,32], index: 4, kind: input, shape index: {}]   ;;  %s335_s5 = inlined_call_operand.vmem [shape: f32[16,32], index: 5, kind: output, shape index: {}]  }
   0x1   :  { %v31_v0 = vld [vmem:[%s330_s3 + $0x18] sm:$0xff]  ;;  %v30_v2 = vld [vmem:[%s330_s3 + $0x10] sm:$0xff]  ;;  %v29_v4 = vld [vmem:[%s330_s3 + $0x8] sm:$0xff] }
   0x2   :  { %v25_v1 = vld [vmem:[%s331_s2 + $0x18] sm:$0xff]  ;;  %227 = vmatprep.subr.mxu0 %v31_v0  ;;  %v24_v3 = vld [vmem:[%s331_s2 + $0x10] sm:$0xff]  ;;  %v23_v5 = vld [vmem:[%s331_s2 + $0x8] sm:$0xff] }
   0x3   :  { %238 = vmatprep.subr.mxu1 %v25_v1  ;;  %228 = vmatpush3.msra.mxu0 %v31_v0  ;;  %v28_v6 = vld [vmem:[%s330_s3] sm:$0xff]  ;;  %v27_v10 = vld [vmem:[%s332_s1 + $0x8] sm:$0xff] }
   0x4   :  { %239 = vmatpush3.msra.mxu1 %v25_v1  ;;  %229 = vmatprep.subr.mxu0 %v30_v2  ;;  %v22_v7 = vld [vmem:[%s331_s2] sm:$0xff]  ;;  %v21_v11 = vld [vmem:[%s333_s0 + $0x8] sm:$0xff] }
   0x5   :  { %240 = vmatprep.subr.mxu1 %v24_v3  ;;  %230 = vmatpush3.msra.mxu0 %v30_v2  ;;  %v26_v8 = vld [vmem:[%s332_s1] sm:$0xff] }
   0x6   :  { %241 = vmatpush3.msra.mxu1 %v24_v3  ;;  %231 = vmatprep.subr.mxu0 %v29_v4  ;;  %v20_v9 = vld [vmem:[%s333_s0] sm:$0xff] }
   0x7   :  { %242 = vmatprep.subr.mxu1 %v23_v5  ;;  %232 = vmatpush3.msra.mxu0 %v29_v4  ;;  %v214_v14 = vld [vmem:[%s334_s4] ss:$0 sm:$0xff] }
   0x8   :  { %243 = vmatpush3.msra.mxu1 %v23_v5  ;;  %233 = vmatprep.subr.mxu0 %v28_v6 }
   0x9   :  { %244 = vmatprep.subr.mxu1 %v22_v7  ;;  %234 = vmatpush3.msra.mxu0 %v28_v6 }
   0xa   :  { %235 = vmatprep.mubr.msk.f32.mxu0 %vm32_vm0, %v26_v8  ;;  %245 = vmatpush3.msra.mxu1 %v22_v7 }
   0xb   :  { %246 = vmatprep.mubr.msk.f32.mxu1 %vm32_vm0, %v20_v9  ;;  %236 = vmatmul.mubr.msk.f32.vlgmr.msra.gmra.mxu0 %vm32_vm0, %v27_v10 }
   0xc   :  { %247 = vmatmul.mubr.msk.f32.vlgmr.msra.gmra.mxu1 %vm32_vm0, %v21_v11 }
  0xcb   :  { %v237_v12 = vpop.f32.mrf.mxu0 }
  0xcc   :  { %v248_v13 = vpop.f32.mrf.mxu1 }
  0xcd   :  { %v192_v15 = vadd.f32 %v248_v13, %v237_v12  ;;  %v105_v16 = vpop.f32.mrf.mxu0 }
  0xce   :  { %v186_v17 = vpop.f32.mrf.mxu1 }
  0xcf   :  { %v203_v18 = vadd.f32 %v214_v14, %v192_v15  ;;  %v187_v19 = vadd.f32 %v186_v17, %v105_v16 }
  0xd1   :  { %205 = vst.msk [vmem:[%s335_s5 + $0x8] sm:$0xff] %vm32_vm0, %v203_v18  ;;  %v202_v20 = vadd.f32 %v214_v14, %v187_v19 }
  0xd3   :  { %204 = vst.msk [vmem:[%s335_s5] sm:$0xff] %vm32_vm0, %v202_v20 }

// kernel: encoder_with_cascade_rnn.7
= control target key start
LH: loop header
LB: loop body
LE: loop exit
PB: predicated region body
PF: predicated region fallthrough
CT: control target
= control target key end

     0   :  { %vm13_vm0 = vcmask 517120   ;;  %v1531_v3 = vmov 0.0   ;;  %s1532_s7 = smov 64   ;;  %vm89_vm1 = vcmask 523264   ;;  %v16_v19 = vlaneseq  ;;  %s1533_s16 = smov 32   ;;  %s2064_s1 = inlined_call_operand.vmem [shape: f32[64,256], index: 1, kind: input, shape index: {}]   ;;  %s2065_s0 = inlined_call_operand.vmem [shape: f32[8,2,256], index: 0, kind: input, shape index: {}]   ;;  %s2066_s2 = inlined_call_operand.vmem [shape: f32[8,2,32], index: 2, kind: output, shape index: {0}]   ;;  %s2067_s3 = inlined_call_operand.vmem [shape: f32[8,2,32], index: 3, kind: output, shape index: {1}]  }
   0x1   :  { %v1557_v0 = vld [vmem:[%s2064_s1 + $0x78] sm:$0xff]  ;;  %v1562_v1 = vld [vmem:[%s2064_s1 + $0x70] sm:$0xff]  ;;  %v1567_v2 = vld [vmem:[%s2064_s1 + $0x68] sm:$0xff]  ;;  %14 = vst.msk [vmem:[#allocation2] sm:$0x3] %vm13_vm0, %v1531_v3  ;;  %157 = vmatprep.mubr.f32.mxu0 %v1531_v3  ;;  %322 = vmatprep.mubr.f32.mxu1 %v1531_v3  ;;  %vm203_vm4 = vcmask 254976  }
   0x2   :  { %15 = vst.msk [vmem:[#allocation3] sm:$0x3] %vm13_vm0, %v1531_v3  ;;  %109 = vmatprep.subr.mxu0 %v1557_v0  ;;  %v1579_v4 = vld [vmem:[%s2064_s1 + $0x60] sm:$0xff]  ;;  %274 = vmatprep.subr.mxu1 %v1557_v0  ;;  %v1586_v5 = vld [vmem:[%s2064_s1 + $0x58] sm:$0xff]  ;;  %v1593_v6 = vld [vmem:[%s2064_s1 + $0x50] sm:$0xff]  ;;  %v17_v20 = vand.u32 127, %v16_v19 }
   0x3   :  { %110 = vmatpush1.msra.mxu0 %v1562_v1  ;;  %275 = vmatpush1.msra.mxu1 %v1562_v1  ;;  %v1600_v7 = vld [vmem:[%s2064_s1 + $0x48] sm:$0xff]  ;;  %v1607_v8 = vld [vmem:[%s2064_s1 + $0x40] sm:$0xff]  ;;  %v1614_v9 = vld [vmem:[%s2064_s1 + $0x38] sm:$0xff] }
   0x4   :  { %111 = vmatprep.subr.mxu0 %v1567_v2  ;;  %276 = vmatprep.subr.mxu1 %v1567_v2  ;;  %v1621_v10 = vld [vmem:[%s2064_s1 + $0x30] sm:$0xff]  ;;  %v1628_v12 = vld [vmem:[%s2064_s1 + $0x28] sm:$0xff]  ;;  %v1635_v13 = vld [vmem:[%s2064_s1 + $0x20] sm:$0xff]  ;;  %v23_v21 = vand.u32 63, %v17_v20  ;;  %v18_v28 = vadd.s32 128, %v17_v20 }
   0x5   :  { %112 = vmatpush1.msra.mxu0 %v1579_v4  ;;  %277 = vmatpush1.msra.mxu1 %v1579_v4  ;;  %v1642_v14 = vld [vmem:[%s2064_s1 + $0x18] sm:$0xff]  ;;  %v1649_v15 = vld [vmem:[%s2064_s1 + $0x10] sm:$0xff]  ;;  %v1656_v16 = vld [vmem:[%s2064_s1 + $0x8] sm:$0xff] }
   0x6   :  { %113 = vmatprep.subr.mxu0 %v1586_v5  ;;  %278 = vmatprep.subr.mxu1 %v1586_v5  ;;  %v1663_v17 = vld [vmem:[%s2064_s1] sm:$0xff]  ;;  %vm1696_vm2 = vcmp.lt.s32.totalorder %v23_v21, 32  ;;  %v1366_v24 = vld.sshfl [vmem:[%s2065_s0 + $0x1c] sm:$0x33 pattern:$0x76325410] }
   0x7   :  { %114 = vmatpush1.msra.mxu0 %v1593_v6  ;;  %279 = vmatpush1.msra.mxu1 %v1593_v6  ;;  %v1365_v22 = vld.sshfl [vmem:[%s2065_s0] sm:$0x33 pattern:$0x76325410]  ;;  %v30_v30 = vand.u32 63, %v18_v28  ;;  %v67_v32 = vcombine.high %v1366_v24, %v1366_v24 }
   0x8   :  { %115 = vmatprep.subr.mxu0 %v1600_v7  ;;  %280 = vmatprep.subr.mxu1 %v1600_v7  ;;  %v72_v18 = vld [vmem:[#allocation2] sm:$0x3]  ;;  %v70_v25 = vsel %vm1696_vm2, %v1365_v22, %v1366_v24  ;;  %v56_v31 = vcombine.high %v1365_v22, %v1365_v22  ;;  %v1745_v56 = vld.sshfl [vmem:[%s2065_s0 + $0x4] sm:$0x33 pattern:$0x76325410] }
   0x9   :  { %v179_v11 = vld [vmem:[#allocation3] sm:$0x3]  ;;  %116 = vmatpush1.msra.mxu0 %v1607_v8  ;;  %281 = vmatpush1.msra.mxu1 %v1607_v8  ;;  %vm1705_vm3 = vcmp.lt.s32.totalorder %v30_v30, 32  ;;  %v1758_v62 = vcombine.high %v1745_v56, %v1745_v56 }
   0xa   :  { %181 = vrot.lane.b32.xlu0 %v179_v11, %s1532_s7  ;;  %117 = vmatprep.subr.mxu0 %v1614_v9  ;;  %v71_v34 = vsel %vm1705_vm3, %v56_v31, %v67_v32  ;;  %v1750_v57 = vld.sshfl [vmem:[%s2065_s0 + $0x18] sm:$0x33 pattern:$0x76325410] }
   0xb   :  { %118 = vmatpush1.msra.mxu0 %v1621_v10  ;;  %282 = vmatprep.subr.mxu1 %v1614_v9  ;;  %v236_v58 = vsel %vm1696_vm2, %v1745_v56, %v1750_v57  ;;  %v1762_v63 = vcombine.high %v1750_v57, %v1750_v57 }
   0xc   :  { %119 = vmatprep.subr.mxu0 %v1628_v12  ;;  %283 = vmatpush1.msra.mxu1 %v1621_v10 }
   0xd   :  { %120 = vmatpush1.msra.mxu0 %v1635_v13  ;;  %284 = vmatprep.subr.mxu1 %v1628_v12  ;;  %v237_v11 = vsel %vm1705_vm3, %v1758_v62, %v1762_v63 }
   0xe   :  { %121 = vmatprep.subr.mxu0 %v1642_v14  ;;  %285 = vmatpush1.msra.mxu1 %v1635_v13 }
   0xf   :  { %122 = vmatpush1.msra.mxu0 %v1649_v15  ;;  %286 = vmatprep.subr.mxu1 %v1642_v14 }
  0x10   :  { %123 = vmatprep.subr.mxu0 %v1656_v16  ;;  %287 = vmatpush1.msra.mxu1 %v1649_v15 }
  0x11   :  { %124 = vmatpush1.msra.mxu0 %v1663_v17  ;;  %288 = vmatprep.subr.mxu1 %v1656_v16 }
  0x12   :  { %1367 = vmatmul.mubr.msk.f32.vlgmr.msra.gmra.mxu0 %vm89_vm1, %v72_v18  ;;  %289 = vmatpush1.msra.mxu1 %v1663_v17 }
  0x13   :  { %439 = vmatprep.subr.mxu0 %v1557_v0  ;;  %487 = vmatprep.mubr.f32.mxu0 %v1531_v3 }
  0x14   :  { %440 = vmatpush1.msra.mxu0 %v1562_v1  ;;  %604 = vmatprep.subr.mxu1 %v1557_v0 }
  0x15   :  { %441 = vmatprep.subr.mxu0 %v1567_v2 }
  0x16   :  { %442 = vmatpush1.msra.mxu0 %v1579_v4 }
  0x17   :  { %443 = vmatprep.subr.mxu0 %v1586_v5 }
  0x18   :  { %444 = vmatpush1.msra.mxu0 %v1593_v6 }
  0x19   :  { %445 = vmatprep.subr.mxu0 %v1600_v7 }
  0x1a   :  { %446 = vmatpush1.msra.mxu0 %v1607_v8 }
  0x1b   :  { %447 = vmatprep.subr.mxu0 %v1614_v9 }
  0x1c   :  { %448 = vmatpush1.msra.mxu0 %v1621_v10 }
  0x1d   :  { %449 = vmatprep.subr.mxu0 %v1628_v12 }
  0x1e   :  { %450 = vmatpush1.msra.mxu0 %v1635_v13 }
  0x1f   :  { %451 = vmatprep.subr.mxu0 %v1642_v14 }
  0x20   :  { %452 = vmatpush1.msra.mxu0 %v1649_v15 }
  0x21   :  { %453 = vmatprep.subr.mxu0 %v1656_v16 }
  0x22   :  { %454 = vmatpush1.msra.mxu0 %v1663_v17 }
  0x23   :  { %767 = vmatprep.subr.mxu0 %v1557_v0 }
  0x7c   :  { %v182_v44 = vpop.permute.xlu0 %181 }
  0xd2   :  { %v159_v26 = vpop.f32.mrf.mxu0 }
  0xd3   :  { %v164_v27 = vadd.f32 %v159_v26, %v70_v25 }
  0xd4   :  { %v161_v35 = vpop.f32.mrf.mxu0 }
  0xd5   :  { %v1368_v29 = vmul.f32 -1.442695, %v164_v27  ;;  %v165_v36 = vadd.f32 %v161_v35, %v71_v34 }
  0xd7   :  { %1435 = vpow2.f32 %v1368_v29  ;;  %v1369_v42 = vmul.f32 -1.442695, %v165_v36 }
  0xd8   :  { %1437 = vtanh.f32 %v165_v36 }
  0xe4   :  { %v1436_v37 = vpop.eup %1435 }
  0xe5   :  { %v169_v38 = vadd.f32 1.0, %v1436_v37  ;;  %v1438_v39 = vpop.eup %1437 }
  0xe7   :  { %1439 = vrcp.f32 %v169_v38 }
  0xe8   :  { %1441 = vpow2.f32 %v1369_v42  ;;  %v1807_v42 = vld.sshfl [vmem:[%s2065_s0 + $0x14] sm:$0x33 pattern:$0x76325410] }
  0xf4   :  { %v1440_v40 = vpop.eup %1439 }
  0xf5   :  { %v185_v41 = vmul.f32 %v1440_v40, %v1438_v39  ;;  %v1442_v43 = vpop.eup %1441  ;;  %v184_v46 = vmul.f32 %v1440_v40, %v182_v44 }
  0xf6   :  { %v176_v45 = vadd.f32 1.0, %v1442_v43 }
  0xf7   :  { %187 = vrot.lane.b32.xlu0 %v185_v41, %s1532_s7  ;;  %v1802_v41 = vld.sshfl [vmem:[%s2065_s0 + $0x8] sm:$0x33 pattern:$0x76325410] }
  0xf8   :  { %1443 = vrcp.f32 %v176_v45  ;;  %v401_v43 = vsel %vm1696_vm2, %v1802_v41, %v1807_v42 }
 0x105   :  { %v1444_v49 = vpop.eup %1443 }
 0x169   :  { %v188_v47 = vpop.permute.xlu0 %187 }
 0x16a   :  { %v190_v48 = vadd.f32 %v188_v47, %v184_v46  ;;  %v1815_v47 = vcombine.high %v1802_v41, %v1802_v41 }
 0x16c   :  { %1445 = vtanh.f32 %v190_v48 }
 0x179   :  { %v1446_v50 = vpop.eup %1445 }
 0x17a   :  { %v1712_v51 = vmul.f32 %v1446_v50, %v1444_v49 }
 0x17c   :  { %199 = vrot.lane.b32.xlu1 %v1712_v51, %s1532_s7 }
 0x180   :  { %194 = vrot.lane.b32.xlu1 %v190_v48, %s1532_s7  ;;  %v1819_v48 = vcombine.high %v1807_v42, %v1807_v42 }
 0x182   :  { %v402_v49 = vsel %vm1705_vm3, %v1815_v47, %v1819_v48 }
 0x1ee   :  { %v200_v52 = vpop.permute.xlu1 %199 }
 0x1ef   :  { %202 = vst.msk [vmem:[#allocation2] sm:$0x3] %vm13_vm0, %v200_v52 }
 0x1f0   :  { %204 = vst.msk [vmem:[%s2066_s2] sm:$0x3] %vm203_vm4, %v200_v52 }
 0x1f2   :  { %v195_v53 = vpop.permute.xlu1 %194 }
 0x1f3   :  { %197 = vst.msk [vmem:[#allocation3] sm:$0x3] %vm13_vm0, %v195_v53 }
 0x1f6   :  { %v238_v54 = vld [vmem:[#allocation2] sm:$0x3] }
 0x1f7   :  { %1375 = vmatmul.mubr.msk.f32.vlgmr.msra.gmra.mxu1 %vm89_vm1, %v238_v54 }
 0x1f8   :  { %605 = vmatpush1.msra.mxu1 %v1562_v1  ;;  %652 = vmatprep.mubr.f32.mxu1 %v1531_v3 }
 0x1f9   :  { %606 = vmatprep.subr.mxu1 %v1567_v2 }
 0x1fa   :  { %v344_v55 = vld [vmem:[#allocation3] sm:$0x3]  ;;  %607 = vmatpush1.msra.mxu1 %v1579_v4 }
 0x1fb   :  { %346 = vrot.lane.b32.xlu0 %v344_v55, %s1532_s7  ;;  %608 = vmatprep.subr.mxu1 %v1586_v5 }
 0x1fc   :  { %609 = vmatpush1.msra.mxu1 %v1593_v6 }
 0x1fd   :  { %610 = vmatprep.subr.mxu1 %v1600_v7 }
 0x1fe   :  { %611 = vmatpush1.msra.mxu1 %v1607_v8 }
 0x1ff   :  { %612 = vmatprep.subr.mxu1 %v1614_v9 }
 0x200   :  { %613 = vmatpush1.msra.mxu1 %v1621_v10 }
 0x201   :  { %614 = vmatprep.subr.mxu1 %v1628_v12 }
 0x202   :  { %615 = vmatpush1.msra.mxu1 %v1635_v13 }
 0x203   :  { %616 = vmatprep.subr.mxu1 %v1642_v14 }
 0x204   :  { %617 = vmatpush1.msra.mxu1 %v1649_v15 }
 0x205   :  { %618 = vmatprep.subr.mxu1 %v1656_v16 }
 0x206   :  { %619 = vmatpush1.msra.mxu1 %v1663_v17 }
 0x207   :  { %930 = vmatprep.subr.mxu1 %v1557_v0 }
 0x26d   :  { %v347_v28 = vpop.permute.xlu0 %346 }
 0x2b7   :  { %v324_v59 = vpop.f32.mrf.mxu1 }
 0x2b8   :  { %v329_v60 = vadd.f32 %v324_v59, %v236_v58 }
 0x2b9   :  { %v326_v18 = vpop.f32.mrf.mxu1 }
 0x2ba   :  { %v1376_v61 = vmul.f32 -1.442695, %v329_v60  ;;  %v330_v19 = vadd.f32 %v326_v18, %v237_v11 }
 0x2bc   :  { %1447 = vpow2.f32 %v1376_v61  ;;  %v1377_v26 = vmul.f32 -1.442695, %v330_v19 }
 0x2bd   :  { %1449 = vtanh.f32 %v330_v19 }
 0x2c9   :  { %v1448_v20 = vpop.eup %1447 }
 0x2ca   :  { %v334_v21 = vadd.f32 1.0, %v1448_v20  ;;  %v1450_v22 = vpop.eup %1449 }
 0x2cc   :  { %1451 = vrcp.f32 %v334_v21 }
 0x2cd   :  { %1453 = vpow2.f32 %v1377_v26 }
 0x2d9   :  { %v1452_v24 = vpop.eup %1451 }
 0x2da   :  { %v350_v25 = vmul.f32 %v1452_v24, %v1450_v22  ;;  %v1454_v27 = vpop.eup %1453  ;;  %v349_v30 = vmul.f32 %v1452_v24, %v347_v28 }
 0x2db   :  { %v341_v29 = vadd.f32 1.0, %v1454_v27 }
 0x2dc   :  { %352 = vrot.lane.b32.xlu1 %v350_v25, %s1532_s7 }
 0x2dd   :  { %1455 = vrcp.f32 %v341_v29 }
 0x2ea   :  { %v1456_v34 = vpop.eup %1455 }
 0x34e   :  { %v353_v31 = vpop.permute.xlu1 %352 }
 0x34f   :  { %v355_v32 = vadd.f32 %v353_v31, %v349_v30  ;;  %v1859_v30 = vld.sshfl [vmem:[%s2065_s0 + $0xc] sm:$0x33 pattern:$0x76325410] }
 0x350   :  { %v1392_v31 = vld.sshfl [vmem:[%s2065_s0 + $0x10] sm:$0x33 pattern:$0x76325410] }
 0x351   :  { %1457 = vtanh.f32 %v355_v32  ;;  %359 = vrot.lane.b32.xlu1 %v355_v32, %s1532_s7  ;;  %v566_v32 = vsel %vm1696_vm2, %v1859_v30, %v1392_v31 }
 0x35e   :  { %v1458_v35 = vpop.eup %1457 }
 0x35f   :  { %v1770_v36 = vmul.f32 %v1458_v35, %v1456_v34 }
 0x361   :  { %364 = vrot.lane.b32.xlu0 %v1770_v36, %s1532_s7 }
 0x3c3   :  { %v360_v37 = vpop.permute.xlu1 %359 }
 0x3c4   :  { %362 = vst.msk [vmem:[#allocation3] sm:$0x3] %vm13_vm0, %v360_v37 }
 0x3cb   :  { %v509_v38 = vld [vmem:[#allocation3] sm:$0x3] }
 0x3cc   :  { %511 = vrot.lane.b32.xlu0 %v509_v38, %s1532_s7  ;;  %v563_v38 = vcombine.high %v1392_v31, %v1392_v31 }
 0x3d3   :  { %v365_v39 = vpop.permute.xlu0 %364 }
 0x3d4   :  { %367 = vst.msk [vmem:[#allocation2] sm:$0x3] %vm13_vm0, %v365_v39 }
 0x3d5   :  { %1378 = vst.msk [vmem:[%s2066_s2 + $0x2] sm:$0x3] %vm203_vm4, %v365_v39 }
 0x3db   :  { %v403_v40 = vld [vmem:[#allocation2] sm:$0x3] }
 0x3dc   :  { %1384 = vmatmul.mubr.msk.f32.vlgmr.msra.gmra.mxu0 %vm89_vm1, %v403_v40 }
 0x3dd   :  { %768 = vmatpush1.msra.mxu0 %v1562_v1  ;;  %815 = vmatprep.mubr.f32.mxu0 %v1531_v3 }
 0x3de   :  { %769 = vmatprep.subr.mxu0 %v1567_v2 }
 0x3df   :  { %770 = vmatpush1.msra.mxu0 %v1579_v4 }
 0x3e0   :  { %771 = vmatprep.subr.mxu0 %v1586_v5 }
 0x3e1   :  { %772 = vmatpush1.msra.mxu0 %v1593_v6 }
 0x3e2   :  { %773 = vmatprep.subr.mxu0 %v1600_v7 }
 0x3e3   :  { %774 = vmatpush1.msra.mxu0 %v1607_v8 }
 0x3e4   :  { %775 = vmatprep.subr.mxu0 %v1614_v9 }
 0x3e5   :  { %776 = vmatpush1.msra.mxu0 %v1621_v10 }
 0x3e6   :  { %777 = vmatprep.subr.mxu0 %v1628_v12 }
 0x3e7   :  { %778 = vmatpush1.msra.mxu0 %v1635_v13 }
 0x3e8   :  { %779 = vmatprep.subr.mxu0 %v1642_v14 }
 0x3e9   :  { %780 = vmatpush1.msra.mxu0 %v1649_v15 }
 0x3ea   :  { %781 = vmatprep.subr.mxu0 %v1656_v16 }
 0x3eb   :  { %782 = vmatpush1.msra.mxu0 %v1663_v17 }
 0x3ec   :  { %1093 = vmatprep.subr.mxu0 %v1557_v0 }
 0x43e   :  { %v512_v11 = vpop.permute.xlu0 %511 }
 0x49c   :  { %v489_v44 = vpop.f32.mrf.mxu0 }
 0x49d   :  { %v494_v45 = vadd.f32 %v489_v44, %v401_v43 }
 0x49e   :  { %v491_v50 = vpop.f32.mrf.mxu0 }
 0x49f   :  { %v1385_v46 = vmul.f32 -1.442695, %v494_v45  ;;  %v495_v52 = vadd.f32 %v491_v50, %v402_v49 }
 0x4a1   :  { %1459 = vpow2.f32 %v1385_v46  ;;  %v1386_v60 = vmul.f32 -1.442695, %v495_v52 }
 0x4a2   :  { %1461 = vtanh.f32 %v495_v52 }
 0x4ae   :  { %v1460_v53 = vpop.eup %1459 }
 0x4af   :  { %v499_v54 = vadd.f32 1.0, %v1460_v53  ;;  %v1462_v55 = vpop.eup %1461 }
 0x4b1   :  { %1463 = vrcp.f32 %v499_v54 }
 0x4b2   :  { %1465 = vpow2.f32 %v1386_v60 }
 0x4be   :  { %v1464_v58 = vpop.eup %1463 }
 0x4bf   :  { %v515_v59 = vmul.f32 %v1464_v58, %v1462_v55  ;;  %v1466_v61 = vpop.eup %1465  ;;  %v514_v19 = vmul.f32 %v1464_v58, %v512_v11 }
 0x4c0   :  { %v506_v18 = vadd.f32 1.0, %v1466_v61 }
 0x4c1   :  { %517 = vrot.lane.b32.xlu1 %v515_v59, %s1532_s7 }
 0x4c2   :  { %1467 = vrcp.f32 %v506_v18 }
 0x4cf   :  { %v1468_v22 = vpop.eup %1467 }
 0x533   :  { %v518_v20 = vpop.permute.xlu1 %517 }
 0x534   :  { %v520_v21 = vadd.f32 %v518_v20, %v514_v19 }
 0x536   :  { %1469 = vtanh.f32 %v520_v21  ;;  %524 = vrot.lane.b32.xlu1 %v520_v21, %s1532_s7 }
 0x543   :  { %v1470_v24 = vpop.eup %1469 }
 0x544   :  { %v1827_v25 = vmul.f32 %v1470_v24, %v1468_v22 }
 0x546   :  { %529 = vrot.lane.b32.xlu0 %v1827_v25, %s1532_s7 }
 0x5a8   :  { %v525_v26 = vpop.permute.xlu1 %524 }
 0x5a9   :  { %527 = vst.msk [vmem:[#allocation3] sm:$0x3] %vm13_vm0, %v525_v26 }
 0x5b0   :  { %v674_v27 = vld [vmem:[#allocation3] sm:$0x3] }
 0x5b1   :  { %676 = vrot.lane.b32.xlu0 %v674_v27, %s1532_s7 }
 0x5b8   :  { %v530_v28 = vpop.permute.xlu0 %529 }
 0x5b9   :  { %532 = vst.msk [vmem:[#allocation2] sm:$0x3] %vm13_vm0, %v530_v28 }
 0x5ba   :  { %1387 = vst.msk [vmem:[%s2066_s2 + $0x4] sm:$0x3] %vm203_vm4, %v530_v28 }
 0x5c0   :  { %v568_v29 = vld [vmem:[#allocation2] sm:$0x3] }
 0x5c1   :  { %1393 = vmatmul.mubr.msk.f32.vlgmr.msra.gmra.mxu1 %vm89_vm1, %v568_v29 }
 0x5c2   :  { %931 = vmatpush1.msra.mxu1 %v1562_v1  ;;  %978 = vmatprep.mubr.f32.mxu1 %v1531_v3 }
 0x5c3   :  { %932 = vmatprep.subr.mxu1 %v1567_v2 }
 0x5c4   :  { %933 = vmatpush1.msra.mxu1 %v1579_v4 }
 0x5c5   :  { %934 = vmatprep.subr.mxu1 %v1586_v5 }
 0x5c6   :  { %935 = vmatpush1.msra.mxu1 %v1593_v6 }
 0x5c7   :  { %936 = vmatprep.subr.mxu1 %v1600_v7 }
 0x5c8   :  { %937 = vmatpush1.msra.mxu1 %v1607_v8 }
 0x5c9   :  { %938 = vmatprep.subr.mxu1 %v1614_v9 }
 0x5ca   :  { %939 = vmatpush1.msra.mxu1 %v1621_v10 }
 0x5cb   :  { %940 = vmatprep.subr.mxu1 %v1628_v12 }
 0x5cc   :  { %941 = vmatpush1.msra.mxu1 %v1635_v13 }
 0x5cd   :  { %942 = vmatprep.subr.mxu1 %v1642_v14 }
 0x5ce   :  { %943 = vmatpush1.msra.mxu1 %v1649_v15 }
 0x5cf   :  { %944 = vmatprep.subr.mxu1 %v1656_v16 }
 0x5d0   :  { %945 = vmatpush1.msra.mxu1 %v1663_v17 }
 0x5d1   :  { %1256 = vmatprep.subr.mxu1 %v1557_v0  ;;  %v552_v0 = vcombine.high %v1859_v30, %v1859_v30 }
 0x5d3   :  { %v567_v39 = vsel %vm1705_vm3, %v552_v0, %v563_v38 }
 0x623   :  { %v677_v54 = vpop.permute.xlu0 %676 }
 0x681   :  { %v654_v34 = vpop.f32.mrf.mxu1 }
 0x682   :  { %v659_v35 = vadd.f32 %v654_v34, %v566_v32 }
 0x683   :  { %v656_v40 = vpop.f32.mrf.mxu1 }
 0x684   :  { %v1394_v37 = vmul.f32 -1.442695, %v659_v35  ;;  %v660_v43 = vadd.f32 %v656_v40, %v567_v39 }
 0x686   :  { %1471 = vpow2.f32 %v1394_v37  ;;  %v1395_v52 = vmul.f32 -1.442695, %v660_v43 }
 0x687   :  { %1473 = vtanh.f32 %v660_v43  ;;  %v892_v43 = vsel %vm1696_vm2, %v1807_v42, %v1802_v41 }
 0x693   :  { %v1472_v44 = vpop.eup %1471 }
 0x694   :  { %v664_v45 = vadd.f32 1.0, %v1472_v44  ;;  %v1474_v46 = vpop.eup %1473 }
 0x696   :  { %1475 = vrcp.f32 %v664_v45 }
 0x697   :  { %1477 = vpow2.f32 %v1395_v52 }
 0x6a3   :  { %v1476_v49 = vpop.eup %1475 }
 0x6a4   :  { %v680_v50 = vmul.f32 %v1476_v49, %v1474_v46  ;;  %v1478_v53 = vpop.eup %1477  ;;  %v679_v58 = vmul.f32 %v1476_v49, %v677_v54 }
 0x6a5   :  { %v671_v55 = vadd.f32 1.0, %v1478_v53 }
 0x6a6   :  { %682 = vrot.lane.b32.xlu1 %v680_v50, %s1532_s7 }
 0x6a7   :  { %1479 = vrcp.f32 %v671_v55 }
 0x6b4   :  { %v1480_v61 = vpop.eup %1479 }
 0x718   :  { %v683_v59 = vpop.permute.xlu1 %682 }
 0x719   :  { %v685_v60 = vadd.f32 %v683_v59, %v679_v58 }
 0x71b   :  { %1481 = vtanh.f32 %v685_v60  ;;  %689 = vrot.lane.b32.xlu1 %v685_v60, %s1532_s7 }
 0x728   :  { %v1482_v11 = vpop.eup %1481 }
 0x729   :  { %v1873_v18 = vmul.f32 %v1482_v11, %v1480_v61 }
 0x72b   :  { %694 = vrot.lane.b32.xlu0 %v1873_v18, %s1532_s7 }
 0x78d   :  { %v690_v19 = vpop.permute.xlu1 %689 }
 0x78e   :  { %692 = vst.msk [vmem:[#allocation3] sm:$0x3] %vm13_vm0, %v690_v19 }
 0x795   :  { %v837_v20 = vld [vmem:[#allocation3] sm:$0x3] }
 0x796   :  { %839 = vrot.lane.b32.xlu0 %v837_v20, %s1532_s7 }
 0x79d   :  { %v695_v21 = vpop.permute.xlu0 %694 }
 0x79e   :  { %697 = vst.msk [vmem:[#allocation2] sm:$0x3] %vm13_vm0, %v695_v21 }
 0x79f   :  { %1396 = vst.msk [vmem:[%s2066_s2 + $0x6] sm:$0x3] %vm203_vm4, %v695_v21  ;;  %v1055_v21 = vsel %vm1696_vm2, %v1750_v57, %v1745_v56 }
 0x7a5   :  { %v731_v22 = vld [vmem:[#allocation2] sm:$0x3] }
 0x7a6   :  { %1402 = vmatmul.mubr.msk.f32.vlgmr.msra.gmra.mxu0 %vm89_vm1, %v731_v22 }
 0x7a7   :  { %1094 = vmatpush1.msra.mxu0 %v1562_v1  ;;  %1141 = vmatprep.mubr.f32.mxu0 %v1531_v3 }
 0x7a8   :  { %1095 = vmatprep.subr.mxu0 %v1567_v2 }
 0x7a9   :  { %1096 = vmatpush1.msra.mxu0 %v1579_v4 }
 0x7aa   :  { %1097 = vmatprep.subr.mxu0 %v1586_v5 }
 0x7ab   :  { %1098 = vmatpush1.msra.mxu0 %v1593_v6  ;;  %v729_v6 = vsel %vm1696_vm2, %v1392_v31, %v1859_v30 }
 0x7ac   :  { %1099 = vmatprep.subr.mxu0 %v1600_v7 }
 0x7ad   :  { %1100 = vmatpush1.msra.mxu0 %v1607_v8 }
 0x7ae   :  { %1101 = vmatprep.subr.mxu0 %v1614_v9 }
 0x7af   :  { %1102 = vmatpush1.msra.mxu0 %v1621_v10  ;;  %v730_v10 = vsel %vm1705_vm3, %v563_v38, %v552_v0 }
 0x7b0   :  { %1103 = vmatprep.subr.mxu0 %v1628_v12 }
 0x7b1   :  { %1104 = vmatpush1.msra.mxu0 %v1635_v13 }
 0x7b2   :  { %1105 = vmatprep.subr.mxu0 %v1642_v14 }
 0x7b3   :  { %1106 = vmatpush1.msra.mxu0 %v1649_v15 }
 0x7b4   :  { %1107 = vmatprep.subr.mxu0 %v1656_v16 }
 0x7b5   :  { %1108 = vmatpush1.msra.mxu0 %v1663_v17 }
 0x808   :  { %v840_v28 = vpop.permute.xlu0 %839 }
 0x866   :  { %v817_v7 = vpop.f32.mrf.mxu0 }
 0x867   :  { %v822_v8 = vadd.f32 %v817_v7, %v729_v6 }
 0x868   :  { %v819_v12 = vpop.f32.mrf.mxu0 }
 0x869   :  { %v1403_v9 = vmul.f32 -1.442695, %v822_v8  ;;  %v823_v13 = vadd.f32 %v819_v12, %v730_v10  ;;  %v1056_v8 = vsel %vm1705_vm3, %v1762_v63, %v1758_v62  ;;  %v1231_v62 = vld [vmem:[%s2064_s1 + $0x50] sm:$0xff]  ;;  %v1230_v63 = vld [vmem:[%s2064_s1 + $0x48] sm:$0xff] }
 0x86b   :  { %1483 = vpow2.f32 %v1403_v9  ;;  %v1404_v26 = vmul.f32 -1.442695, %v823_v13 }
 0x86c   :  { %1485 = vtanh.f32 %v823_v13 }
 0x878   :  { %v1484_v14 = vpop.eup %1483 }
 0x879   :  { %v827_v24 = vadd.f32 1.0, %v1484_v14  ;;  %v1486_v15 = vpop.eup %1485 }
 0x87b   :  { %1487 = vrcp.f32 %v827_v24 }
 0x87c   :  { %1489 = vpow2.f32 %v1404_v26 }
 0x888   :  { %v1488_v16 = vpop.eup %1487 }
 0x889   :  { %v843_v17 = vmul.f32 %v1488_v16, %v1486_v15  ;;  %v1490_v27 = vpop.eup %1489  ;;  %v842_v30 = vmul.f32 %v1488_v16, %v840_v28 }
 0x88a   :  { %v834_v29 = vadd.f32 1.0, %v1490_v27 }
 0x88b   :  { %845 = vrot.lane.b32.xlu1 %v843_v17, %s1532_s7 }
 0x88c   :  { %1491 = vrcp.f32 %v834_v29  ;;  %v1229_v29 = vld [vmem:[%s2064_s1 + $0x40] sm:$0xff] }
 0x899   :  { %v1492_v34 = vpop.eup %1491 }
 0x8fd   :  { %v846_v31 = vpop.permute.xlu1 %845 }
 0x8fe   :  { %v848_v32 = vadd.f32 %v846_v31, %v842_v30  ;;  %v1228_v30 = vld [vmem:[%s2064_s1 + $0x38] sm:$0xff]  ;;  %v1227_v31 = vld [vmem:[%s2064_s1 + $0x30] sm:$0xff] }
 0x900   :  { %1493 = vtanh.f32 %v848_v32  ;;  %852 = vrot.lane.b32.xlu1 %v848_v32, %s1532_s7  ;;  %v1226_v32 = vld [vmem:[%s2064_s1 + $0x28] sm:$0xff] }
 0x90d   :  { %v1494_v35 = vpop.eup %1493 }
 0x90e   :  { %v1908_v37 = vmul.f32 %v1494_v35, %v1492_v34  ;;  %v1225_v34 = vld [vmem:[%s2064_s1 + $0x20] sm:$0xff]  ;;  %v1224_v35 = vld [vmem:[%s2064_s1 + $0x18] sm:$0xff] }
 0x910   :  { %857 = vrot.lane.b32.xlu0 %v1908_v37, %s1532_s7 }
 0x972   :  { %v853_v0 = vpop.permute.xlu1 %852 }
 0x973   :  { %855 = vst.msk [vmem:[#allocation3] sm:$0x3] %vm13_vm0, %v853_v0  ;;  %v1223_v0 = vld [vmem:[%s2064_s1 + $0x10] sm:$0xff] }
 0x97a   :  { %v1000_v38 = vld [vmem:[#allocation3] sm:$0x3] }
 0x97b   :  { %1002 = vrot.lane.b32.xlu0 %v1000_v38, %s1532_s7  ;;  %v1222_v38 = vld [vmem:[%s2064_s1 + $0x8] sm:$0xff] }
 0x982   :  { %v858_v39 = vpop.permute.xlu0 %857 }
 0x983   :  { %860 = vst.msk [vmem:[#allocation2] sm:$0x3] %vm13_vm0, %v858_v39 }
 0x984   :  { %1405 = vst.msk [vmem:[%s2066_s2 + $0x8] sm:$0x3] %vm203_vm4, %v858_v39  ;;  %v1221_v39 = vld [vmem:[%s2064_s1] sm:$0xff] }
 0x98a   :  { %v894_v40 = vld [vmem:[#allocation2] sm:$0x3] }
 0x98b   :  { %1411 = vmatmul.mubr.msk.f32.vlgmr.msra.gmra.mxu1 %vm89_vm1, %v894_v40 }
 0x98c   :  { %1257 = vmatpush1.msra.mxu1 %v1562_v1  ;;  %1304 = vmatprep.mubr.f32.mxu1 %v1531_v3  ;;  %v893_v1 = vsel %vm1705_vm3, %v1819_v48, %v1815_v47 }
 0x98d   :  { %1258 = vmatprep.subr.mxu1 %v1567_v2 }
 0x98e   :  { %1259 = vmatpush1.msra.mxu1 %v1579_v4 }
 0x98f   :  { %1260 = vmatprep.subr.mxu1 %v1586_v5 }
 0x990   :  { %1261 = vmatpush1.msra.mxu1 %v1231_v62 }
 0x991   :  { %1262 = vmatprep.subr.mxu1 %v1230_v63 }
 0x992   :  { %1263 = vmatpush1.msra.mxu1 %v1229_v29 }
 0x993   :  { %1264 = vmatprep.subr.mxu1 %v1228_v30 }
 0x994   :  { %1265 = vmatpush1.msra.mxu1 %v1227_v31 }
 0x995   :  { %1266 = vmatprep.subr.mxu1 %v1226_v32 }
 0x996   :  { %1267 = vmatpush1.msra.mxu1 %v1225_v34 }
 0x997   :  { %1268 = vmatprep.subr.mxu1 %v1224_v35 }
 0x998   :  { %1269 = vmatpush1.msra.mxu1 %v1223_v0 }
 0x999   :  { %1270 = vmatprep.subr.mxu1 %v1222_v38 }
 0x99a   :  { %1271 = vmatpush1.msra.mxu1 %v1221_v39 }
 0x9ed   :  { %v1003_v53 = vpop.permute.xlu0 %1002 }
 0xa4b   :  { %v980_v44 = vpop.f32.mrf.mxu1 }
 0xa4c   :  { %v985_v45 = vadd.f32 %v980_v44, %v892_v43 }
 0xa4d   :  { %v982_v3 = vpop.f32.mrf.mxu1 }
 0xa4e   :  { %v1412_v46 = vmul.f32 -1.442695, %v985_v45  ;;  %v986_v2 = vadd.f32 %v982_v3, %v893_v1 }
 0xa50   :  { %1495 = vpow2.f32 %v1412_v46  ;;  %v1413_v41 = vmul.f32 -1.442695, %v986_v2 }
 0xa51   :  { %1497 = vtanh.f32 %v986_v2 }
 0xa5d   :  { %v1496_v49 = vpop.eup %1495 }
 0xa5e   :  { %v990_v4 = vadd.f32 1.0, %v1496_v49  ;;  %v1498_v5 = vpop.eup %1497 }
 0xa60   :  { %1499 = vrcp.f32 %v990_v4  ;;  %v1426_v4 = vld.sshfl [vmem:[%s2065_s0 + $0x1c] sm:$0x33 pattern:$0x76325410] }
 0xa61   :  { %1501 = vpow2.f32 %v1413_v41 }
 0xa6d   :  { %v1500_v50 = vpop.eup %1499 }
 0xa6e   :  { %v1006_v52 = vmul.f32 %v1500_v50, %v1498_v5  ;;  %v1502_v42 = vpop.eup %1501  ;;  %v1005_v55 = vmul.f32 %v1500_v50, %v1003_v53  ;;  %v1427_v5 = vld.sshfl [vmem:[%s2065_s0] sm:$0x33 pattern:$0x76325410]  ;;  %v1204_v53 = vcombine.high %v1426_v4, %v1426_v4 }
 0xa6f   :  { %v997_v54 = vadd.f32 1.0, %v1502_v42  ;;  %v1218_v50 = vsel %vm1696_vm2, %v1426_v4, %v1427_v5 }
 0xa70   :  { %1008 = vrot.lane.b32.xlu1 %v1006_v52, %s1532_s7 }
 0xa71   :  { %1503 = vrcp.f32 %v997_v54  ;;  %v1215_v54 = vcombine.high %v1427_v5, %v1427_v5 }
 0xa7e   :  { %v1504_v47 = vpop.eup %1503 }
 0xae2   :  { %v1009_v58 = vpop.permute.xlu1 %1008 }
 0xae3   :  { %v1011_v59 = vadd.f32 %v1009_v58, %v1005_v55  ;;  %v1219_v55 = vsel %vm1705_vm3, %v1204_v53, %v1215_v54 }
 0xae5   :  { %1505 = vtanh.f32 %v1011_v59  ;;  %1015 = vrot.lane.b32.xlu1 %v1011_v59, %s1532_s7 }
 0xaf2   :  { %v1506_v48 = vpop.eup %1505 }
 0xaf3   :  { %v1935_v60 = vmul.f32 %v1506_v48, %v1504_v47 }
 0xaf5   :  { %1020 = vrot.lane.b32.xlu0 %v1935_v60, %s1532_s7 }
 0xb57   :  { %v1016_v61 = vpop.permute.xlu1 %1015 }
 0xb58   :  { %1018 = vst.msk [vmem:[#allocation3] sm:$0x3] %vm13_vm0, %v1016_v61 }
 0xb5f   :  { %v1163_v11 = vld [vmem:[#allocation3] sm:$0x3] }
 0xb60   :  { %1165 = vrot.lane.b32.xlu0 %v1163_v11, %s1532_s7 }
 0xb67   :  { %v1021_v19 = vpop.permute.xlu0 %1020 }
 0xb68   :  { %1023 = vst.msk [vmem:[#allocation2] sm:$0x3] %vm13_vm0, %v1021_v19 }
 0xb69   :  { %1414 = vst.msk [vmem:[%s2066_s2 + $0xa] sm:$0x3] %vm203_vm4, %v1021_v19 }
 0xb6f   :  { %v1057_v20 = vld [vmem:[#allocation2] sm:$0x3] }
 0xb70   :  { %1420 = vmatmul.mubr.msk.f32.vlgmr.msra.gmra.mxu0 %vm89_vm1, %v1057_v20 }
 0xbd2   :  { %v1166_v16 = vpop.permute.xlu0 %1165 }
 0xc30   :  { %v1143_v22 = vpop.f32.mrf.mxu0 }
 0xc31   :  { %v1148_v6 = vadd.f32 %v1143_v22, %v1055_v21 }
 0xc32   :  { %v1145_v9 = vpop.f32.mrf.mxu0 }
 0xc33   :  { %v1421_v7 = vmul.f32 -1.442695, %v1148_v6  ;;  %v1149_v10 = vadd.f32 %v1145_v9, %v1056_v8 }
 0xc35   :  { %1507 = vpow2.f32 %v1421_v7  ;;  %v1422_v56 = vmul.f32 -1.442695, %v1149_v10 }
 0xc36   :  { %1509 = vtanh.f32 %v1149_v10 }
 0xc42   :  { %v1508_v12 = vpop.eup %1507 }
 0xc43   :  { %v1153_v13 = vadd.f32 1.0, %v1508_v12  ;;  %v1510_v14 = vpop.eup %1509 }
 0xc45   :  { %1511 = vrcp.f32 %v1153_v13 }
 0xc46   :  { %1513 = vpow2.f32 %v1422_v56 }
 0xc52   :  { %v1512_v24 = vpop.eup %1511 }
 0xc53   :  { %v1169_v15 = vmul.f32 %v1512_v24, %v1510_v14  ;;  %v1514_v57 = vpop.eup %1513  ;;  %v1168_v26 = vmul.f32 %v1512_v24, %v1166_v16 }
 0xc54   :  { %v1160_v17 = vadd.f32 1.0, %v1514_v57 }
 0xc55   :  { %1171 = vrot.lane.b32.xlu1 %v1169_v15, %s1532_s7 }
 0xc56   :  { %1515 = vrcp.f32 %v1160_v17 }
 0xc63   :  { %v1516_v40 = vpop.eup %1515 }
 0xcc7   :  { %v1172_v27 = vpop.permute.xlu1 %1171 }
 0xcc8   :  { %v1174_v28 = vadd.f32 %v1172_v27, %v1168_v26 }
 0xcca   :  { %1517 = vtanh.f32 %v1174_v28  ;;  %1178 = vrot.lane.b32.xlu1 %v1174_v28, %s1532_s7 }
 0xcd7   :  { %v1518_v43 = vpop.eup %1517 }
 0xcd8   :  { %v1176_v44 = vmul.f32 %v1518_v43, %v1516_v40 }
 0xcda   :  { %1183 = vrot.lane.b32.xlu0 %v1176_v44, %s1532_s7 }
 0xd3c   :  { %v1179_v45 = vpop.permute.xlu1 %1178 }
 0xd3d   :  { %1181 = vst.msk [vmem:[#allocation3] sm:$0x3] %vm13_vm0, %v1179_v45 }
 0xd44   :  { %v1326_v46 = vld [vmem:[#allocation3] sm:$0x3] }
 0xd45   :  { %1328 = vrot.lane.b32.xlu0 %v1326_v46, %s1532_s7 }
 0xd49   :  { %205 = vrot.lane.b32.xlu0 %v1712_v51, %s1533_s16 }
 0xd4c   :  { %v1184_v1 = vpop.permute.xlu0 %1183 }
 0xd4d   :  { %1186 = vst.msk [vmem:[#allocation2] sm:$0x3] %vm13_vm0, %v1184_v1  ;;  %535 = vrot.lane.b32.xlu0 %v1827_v25, %s1533_s16 }
 0xd4e   :  { %1423 = vst.msk [vmem:[%s2066_s2 + $0xc] sm:$0x3] %vm203_vm4, %v1184_v1 }
 0xd51   :  { %863 = vrot.lane.b32.xlu0 %v1908_v37, %s1533_s16 }
 0xd54   :  { %v1220_v3 = vld [vmem:[#allocation2] sm:$0x3] }
 0xd55   :  { %1189 = vrot.lane.b32.xlu0 %v1176_v44, %s1533_s16  ;;  %1428 = vmatmul.mubr.msk.f32.vlgmr.msra.gmra.mxu1 %vm89_vm1, %v1220_v3 }
 0xdb7   :  { %v1329_v51 = vpop.permute.xlu0 %1328 }
 0xdbb   :  { %v206_v2 = vpop.permute.xlu0 %205 }
 0xdbc   :  { %1370 = vst.msk [vmem:[%s2067_s3 + $0xe] sm:$0x3] %vm203_vm4, %v206_v2 }
 0xdbf   :  { %v536_v49 = vpop.permute.xlu0 %535 }
 0xdc0   :  { %1388 = vst.msk [vmem:[%s2067_s3 + $0xa] sm:$0x3] %vm203_vm4, %v536_v49 }
 0xdc3   :  { %v864_v25 = vpop.permute.xlu0 %863 }
 0xdc4   :  { %1406 = vst.msk [vmem:[%s2067_s3 + $0x6] sm:$0x3] %vm203_vm4, %v864_v25 }
 0xdc7   :  { %v1190_v37 = vpop.permute.xlu0 %1189 }
 0xdc8   :  { %1424 = vst.msk [vmem:[%s2067_s3 + $0x2] sm:$0x3] %vm203_vm4, %v1190_v37 }
 0xe15   :  { %v1306_v52 = vpop.f32.mrf.mxu1 }
 0xe16   :  { %v1311_v41 = vadd.f32 %v1306_v52, %v1218_v50 }
 0xe17   :  { %v1308_v58 = vpop.f32.mrf.mxu1 }
 0xe18   :  { %v1429_v42 = vmul.f32 -1.442695, %v1311_v41  ;;  %v1312_v59 = vadd.f32 %v1308_v58, %v1219_v55 }
 0xe1a   :  { %1519 = vpow2.f32 %v1429_v42  ;;  %v1430_v23 = vmul.f32 -1.442695, %v1312_v59 }
 0xe1b   :  { %1521 = vtanh.f32 %v1312_v59 }
 0xe27   :  { %v1520_v47 = vpop.eup %1519 }
 0xe28   :  { %v1316_v48 = vadd.f32 1.0, %v1520_v47  ;;  %v1522_v61 = vpop.eup %1521 }
 0xe2a   :  { %1523 = vrcp.f32 %v1316_v48 }
 0xe2b   :  { %1525 = vpow2.f32 %v1430_v23 }
 0xe37   :  { %v1524_v11 = vpop.eup %1523 }
 0xe38   :  { %v1332_v19 = vmul.f32 %v1524_v11, %v1522_v61  ;;  %v1526_v33 = vpop.eup %1525  ;;  %v1331_v21 = vmul.f32 %v1524_v11, %v1329_v51 }
 0xe39   :  { %v1323_v20 = vadd.f32 1.0, %v1526_v33 }
 0xe3a   :  { %1334 = vrot.lane.b32.xlu1 %v1332_v19, %s1532_s7 }
 0xe3b   :  { %1527 = vrcp.f32 %v1323_v20 }
 0xe3e   :  { %370 = vrot.lane.b32.xlu1 %v1770_v36, %s1533_s16 }
 0xe42   :  { %700 = vrot.lane.b32.xlu1 %v1873_v18, %s1533_s16 }
 0xe46   :  { %1026 = vrot.lane.b32.xlu1 %v1935_v60, %s1533_s16 }
 0xe48   :  { %v1528_v60 = vpop.eup %1527 }
 0xeac   :  { %v1335_v22 = vpop.permute.xlu1 %1334 }
 0xead   :  { %v1337_v6 = vadd.f32 %v1335_v22, %v1331_v21 }
 0xeaf   :  { %1529 = vtanh.f32 %v1337_v6  ;;  %1341 = vrot.lane.b32.xlu1 %v1337_v6, %s1532_s7 }
 0xeb0   :  { %v371_v7 = vpop.permute.xlu1 %370 }
 0xeb1   :  { %1379 = vst.msk [vmem:[%s2067_s3 + $0xc] sm:$0x3] %vm203_vm4, %v371_v7 }
 0xeb4   :  { %v701_v36 = vpop.permute.xlu1 %700 }
 0xeb5   :  { %1397 = vst.msk [vmem:[%s2067_s3 + $0x8] sm:$0x3] %vm203_vm4, %v701_v36 }
 0xeb8   :  { %v1027_v18 = vpop.permute.xlu1 %1026 }
 0xeb9   :  { %1415 = vst.msk [vmem:[%s2067_s3 + $0x4] sm:$0x3] %vm203_vm4, %v1027_v18 }
 0xebc   :  { %v1530_v8 = vpop.eup %1529 }
 0xebd   :  { %v1339_v9 = vmul.f32 %v1530_v8, %v1528_v60 }
 0xebf   :  { %1352 = vrot.lane.b32.xlu1 %v1339_v9, %s1533_s16  ;;  %1346 = vrot.lane.b32.xlu0 %v1339_v9, %s1532_s7 }
 0xf21   :  { %v1342_v10 = vpop.permute.xlu1 %1341 }
 0xf22   :  { %1344 = vst.msk [vmem:[#allocation3] sm:$0x3] %vm13_vm0, %v1342_v10 }
 0xf31   :  { %v1353_v12 = vpop.permute.xlu1 %1352  ;;  %v1347_v13 = vpop.permute.xlu0 %1346 }
 0xf32   :  { %1355 = vst.msk [vmem:[%s2067_s3] sm:$0x3] %vm203_vm4, %v1353_v12  ;;  %1431 = vst.msk [vmem:[%s2066_s2 + $0xe] sm:$0x3] %vm203_vm4, %v1347_v13 }
 0xf33   :  { %1349 = vst.msk [vmem:[#allocation2] sm:$0x3] %vm13_vm0, %v1347_v13 }

// kernel: encoder_with_cascade_rnn.11
= control target key start
LH: loop header
LB: loop body
LE: loop exit
PB: predicated region body
PF: predicated region fallthrough
CT: control target
= control target key end

     0   :  { %vm32_vm0 = vcmask 261120   ;;  %vm204_vm1 = vcmask 392192   ;;  %s325_s3 = inlined_call_operand.vmem [shape: f32[32,48], index: 3, kind: input, shape index: {}]   ;;  %s326_s2 = inlined_call_operand.vmem [shape: f32[32,48], index: 2, kind: input, shape index: {}]   ;;  %s327_s1 = inlined_call_operand.vmem [shape: f32[16,32], index: 1, kind: input, shape index: {}]   ;;  %s328_s0 = inlined_call_operand.vmem [shape: f32[16,32], index: 0, kind: input, shape index: {}]   ;;  %s329_s4 = inlined_call_operand.vmem [shape: f32[1,48], index: 4, kind: input, shape index: {}]   ;;  %s330_s5 = inlined_call_operand.vmem [shape: f32[16,48], index: 5, kind: output, shape index: {}]  }
   0x1   :  { %v31_v0 = vld [vmem:[%s325_s3 + $0x18] sm:$0xff]  ;;  %v30_v2 = vld [vmem:[%s325_s3 + $0x10] sm:$0xff]  ;;  %v29_v4 = vld [vmem:[%s325_s3 + $0x8] sm:$0xff] }
   0x2   :  { %v25_v1 = vld [vmem:[%s326_s2 + $0x18] sm:$0xff]  ;;  %228 = vmatprep.subr.mxu0 %v31_v0  ;;  %v24_v3 = vld [vmem:[%s326_s2 + $0x10] sm:$0xff]  ;;  %v23_v5 = vld [vmem:[%s326_s2 + $0x8] sm:$0xff] }
   0x3   :  { %239 = vmatprep.subr.mxu1 %v25_v1  ;;  %229 = vmatpush3.msra.mxu0 %v31_v0  ;;  %v28_v6 = vld [vmem:[%s325_s3] sm:$0xff]  ;;  %v27_v10 = vld [vmem:[%s327_s1 + $0x8] sm:$0xff] }
   0x4   :  { %240 = vmatpush3.msra.mxu1 %v25_v1  ;;  %230 = vmatprep.subr.mxu0 %v30_v2  ;;  %v22_v7 = vld [vmem:[%s326_s2] sm:$0xff]  ;;  %v21_v11 = vld [vmem:[%s328_s0 + $0x8] sm:$0xff] }
   0x5   :  { %241 = vmatprep.subr.mxu1 %v24_v3  ;;  %231 = vmatpush3.msra.mxu0 %v30_v2  ;;  %v26_v8 = vld [vmem:[%s327_s1] sm:$0xff] }
   0x6   :  { %242 = vmatpush3.msra.mxu1 %v24_v3  ;;  %232 = vmatprep.subr.mxu0 %v29_v4  ;;  %v20_v9 = vld [vmem:[%s328_s0] sm:$0xff] }
   0x7   :  { %243 = vmatprep.subr.mxu1 %v23_v5  ;;  %233 = vmatpush3.msra.mxu0 %v29_v4  ;;  %v215_v14 = vld [vmem:[%s329_s4] ss:$0 sm:$0xff] }
   0x8   :  { %244 = vmatpush3.msra.mxu1 %v23_v5  ;;  %234 = vmatprep.subr.mxu0 %v28_v6 }
   0x9   :  { %245 = vmatprep.subr.mxu1 %v22_v7  ;;  %235 = vmatpush3.msra.mxu0 %v28_v6 }
   0xa   :  { %236 = vmatprep.mubr.msk.f32.mxu0 %vm32_vm0, %v26_v8  ;;  %246 = vmatpush3.msra.mxu1 %v22_v7 }
   0xb   :  { %247 = vmatprep.mubr.msk.f32.mxu1 %vm32_vm0, %v20_v9  ;;  %237 = vmatmul.mubr.msk.f32.vlgmr.msra.gmra.mxu0 %vm32_vm0, %v27_v10 }
   0xc   :  { %248 = vmatmul.mubr.msk.f32.vlgmr.msra.gmra.mxu1 %vm32_vm0, %v21_v11 }
  0xcb   :  { %v238_v12 = vpop.f32.mrf.mxu0 }
  0xcc   :  { %v249_v13 = vpop.f32.mrf.mxu1 }
  0xcd   :  { %v192_v15 = vadd.f32 %v249_v13, %v238_v12  ;;  %v105_v16 = vpop.f32.mrf.mxu0 }
  0xce   :  { %v186_v17 = vpop.f32.mrf.mxu1 }
  0xcf   :  { %v203_v18 = vadd.f32 %v215_v14, %v192_v15  ;;  %v187_v19 = vadd.f32 %v186_v17, %v105_v16 }
  0xd1   :  { %206 = vst.msk [vmem:[%s330_s5 + $0x8] sm:$0xff] %vm204_vm1, %v203_v18  ;;  %v202_v20 = vadd.f32 %v215_v14, %v187_v19 }
  0xd3   :  { %205 = vst.msk [vmem:[%s330_s5] sm:$0xff] %vm204_vm1, %v202_v20 }

</bundles_post_ra>
